<compile_context>
chip_gen: v7x
topology: tpu7x:2x2x1
jax: 0.10.0
libtpu: 0.0.40
codegen_flags: <defaults>
</compile_context>

<pallas_src>
import functools

import jax
import jax.numpy as jnp
from jax.experimental import pallas as pl
from jax.experimental.pallas import tpu as pltpu  # noqa: F401  (TPU backend)

LANE = 128


def _round_up(x, m):
    return ((x + m - 1) // m) * m


def _pad_last(x, target):
    pad = target - x.shape[-1]
    if pad <= 0:
        return x
    widths = [(0, 0)] * (x.ndim - 1) + [(0, pad)]
    return jnp.pad(x, widths)


# ----------------------------------------------------------------------------
# Fused kernel: encoder -> depth x [aggregate, W, LayerNorm, relu, residual]
#               -> MLAP weighted pooling -> T-step LSTM decoder + projection.
# Everything lives in VMEM for the whole forward; loops are statically
# unrolled (depth and T are tiny, compile-time constants).
# ----------------------------------------------------------------------------
def _fused_forward_kernel(x_ref, adjblk_ref, xseq_ref,
                          w_enc_ref, b_enc_ref, gw_ref, gb_ref,
                          att_ref, lw_ref,
                          wih_ref, whh_ref, blstm_ref, wout_ref, bout_ref,
                          logits_ref,
                          *, depth, d_real, B, N, T):
    BN = B * N
    Fp = x_ref.shape[-1]
    Dp = w_enc_ref.shape[1]

    # Lane-validity mask for the padded feature dim (hoisted; used by the
    # masked LayerNorm so statistics cover the real d_real features only).
    lane_idx = jax.lax.broadcasted_iota(jnp.int32, (1, Dp), 1)
    feat_mask = (lane_idx < d_real).astype(jnp.float32)             # (1, Dp)
    inv_d = 1.0 / float(d_real)

    att_all = att_ref[...]                                          # (L, Dp)
    lw_all = lw_ref[...]                                            # (L, Dp)

    def pool(h2, level, acc):
        h3 = h2.reshape(B, N, Dp)
        att_l = att_all[level:level + 1][None]                      # (1,1,Dp)
        scores = jnp.sum(h3 * att_l, axis=-1)                       # (B, N)
        scores = scores - jnp.max(scores, axis=-1, keepdims=True)
        e = jnp.exp(scores)
        w = e / jnp.sum(e, axis=-1, keepdims=True)                  # softmax/nodes
        pooled = jnp.einsum('bqn,bnd->bqd', w[:, None, :], h3,
                            preferred_element_type=jnp.float32)[:, 0, :]
        return acc + lw_all[level:level + 1] * pooled               # (B, Dp)

    # --- node encoder: h0 = relu(x @ W_enc + b_enc) ---
    x2 = x_ref[...].reshape(BN, Fp)
    h2 = jnp.maximum(
        jnp.dot(x2, w_enc_ref[...], preferred_element_type=jnp.float32)
        + b_enc_ref[...], 0.0)                                      # (BN, Dp)

    acc = pool(h2, 0, jnp.zeros((B, Dp), jnp.float32))

    # --- GNN layers (block-diag adjacency -> one MXU matmul per layer) ---
    adj = adjblk_ref[...]                                           # (BN, BN)
    for l in range(depth):                                          # static
        m = jnp.dot(adj, h2, preferred_element_type=jnp.float32)    # aggregate
        z = (jnp.dot(m, gw_ref[l], preferred_element_type=jnp.float32)
             + gb_ref[l])
        # masked LayerNorm over the d_real valid lanes (norm=True, no affine)
        mu = jnp.sum(z * feat_mask, axis=-1, keepdims=True) * inv_d
        diff = (z - mu) * feat_mask
        var = jnp.sum(diff * diff, axis=-1, keepdims=True) * inv_d
        zn = diff * jax.lax.rsqrt(var + 1e-5)
        h2 = jnp.maximum(zn, 0.0) + h2                              # relu + residual
        acc = pool(h2, l + 1, acc)

    # --- LSTM decoder (teacher forcing), h0 = graph embedding, c0 = 0 ---
    emb = acc                                                       # (B, Dp)
    wih = wih_ref[...]                                              # (Dp, 4Dp)
    whh = whh_ref[...]
    b_lstm = blstm_ref[...]                                         # (1, 4Dp)
    wout = wout_ref[...]                                            # (Dp, Vp)
    bout = bout_ref[...]                                            # (1, Vp)

    h = emb
    c = jnp.zeros((B, Dp), jnp.float32)
    for t in range(T):                                              # static
        x_t = xseq_ref[t]                                           # (B, Dp)
        gates = (jnp.dot(x_t, wih, preferred_element_type=jnp.float32)
                 + jnp.dot(h, whh, preferred_element_type=jnp.float32)
                 + b_lstm)                                          # (B, 4Dp)
        i = jax.nn.sigmoid(gates[:, 0 * Dp:1 * Dp])
        f = jax.nn.sigmoid(gates[:, 1 * Dp:2 * Dp])
        g = jnp.tanh(gates[:, 2 * Dp:3 * Dp])
        o = jax.nn.sigmoid(gates[:, 3 * Dp:4 * Dp])
        c = f * c + i * g
        h = o * jnp.tanh(c)
        logits_ref[t] = (jnp.dot(h, wout, preferred_element_type=jnp.float32)
                         + bout)                                    # (B, Vp)


def fused_forward(x_pad, adj_blk, x_seq, pp, *, depth, d_real, B, N, T):
    Vp = pp["w_out"].shape[1]
    kernel = functools.partial(_fused_forward_kernel, depth=depth,
                               d_real=d_real, B=B, N=N, T=T)
    return pl.pallas_call(
        kernel,
        out_shape=jax.ShapeDtypeStruct((T, B, Vp), jnp.float32),
    )(x_pad, adj_blk, x_seq,
      pp["w_enc"], pp["b_enc"], pp["gw"], pp["gb"], pp["att"], pp["lw_b"],
      pp["w_ih"], pp["w_hh"], pp["b_lstm"], pp["w_out"], pp["b_out"])


# ----------------------------------------------------------------------------
# Parameter construction (real sizes) and zero-padding to lane-dense layouts.
# Padding is done ONCE, outside the jitted forward.
# ----------------------------------------------------------------------------
def make_params(key, f_in, dim_h, depth, vocab):
    L = depth + 1
    ks = jax.random.split(key, 12)
    s = 0.1
    params = {
        "w_enc": s * jax.random.normal(ks[0], (f_in, dim_h), jnp.float32),
        "b_enc": jnp.zeros((1, dim_h), jnp.float32),
        "gnn_w": [s * jax.random.normal(jax.random.fold_in(ks[1], l),
                                        (dim_h, dim_h), jnp.float32)
                  for l in range(depth)],
        "gnn_b": [jnp.zeros((1, dim_h), jnp.float32) for _ in range(depth)],
        "att": s * jax.random.normal(ks[2], (L, dim_h), jnp.float32),
        "layer_logits": jax.random.normal(ks[3], (L,), jnp.float32),
        "emb_table": s * jax.random.normal(ks[4], (vocab, dim_h), jnp.float32),
        "w_ih": s * jax.random.normal(ks[5], (dim_h, 4 * dim_h), jnp.float32),
        "w_hh": s * jax.random.normal(ks[6], (dim_h, 4 * dim_h), jnp.float32),
        "b_lstm": jnp.zeros((1, 4 * dim_h), jnp.float32),
        "w_out": s * jax.random.normal(ks[7], (dim_h, vocab), jnp.float32),
        "b_out": jnp.zeros((1, vocab), jnp.float32),
    }
    return params


def pad_params(params, f_in, dim_h, depth, vocab):
    Fp = _round_up(f_in, LANE)
    Dp = _round_up(dim_h, LANE)
    Vp = _round_up(vocab, LANE)
    D = dim_h
    L = depth + 1

    w_enc = jnp.zeros((Fp, Dp), jnp.float32).at[:f_in, :D].set(params["w_enc"])
    b_enc = jnp.zeros((1, Dp), jnp.float32).at[:, :D].set(params["b_enc"])

    gw = jnp.zeros((depth, Dp, Dp), jnp.float32)
    gb = jnp.zeros((depth, 1, Dp), jnp.float32)
    for l in range(depth):
        gw = gw.at[l, :D, :D].set(params["gnn_w"][l])
        gb = gb.at[l, :, :D].set(params["gnn_b"][l])

    att = jnp.zeros((L, Dp), jnp.float32).at[:, :D].set(params["att"])
    layer_w = jax.nn.softmax(params["layer_logits"])                 # (L,)
    lw_b = jnp.broadcast_to(layer_w[:, None], (L, Dp)).astype(jnp.float32)

    emb_table = jnp.zeros((vocab, Dp), jnp.float32).at[:, :D].set(
        params["emb_table"])

    # gate-aligned padding: gate k of the real (D, 4D) weight lands in lanes
    # [k*Dp, k*Dp + D) of the padded (Dp, 4Dp) weight -> 128-aligned slices.
    w_ih = jnp.zeros((Dp, 4 * Dp), jnp.float32)
    w_hh = jnp.zeros((Dp, 4 * Dp), jnp.float32)
    b_l = jnp.zeros((1, 4 * Dp), jnp.float32)
    for k in range(4):
        w_ih = w_ih.at[:D, k * Dp:k * Dp + D].set(
            params["w_ih"][:, k * D:(k + 1) * D])
        w_hh = w_hh.at[:D, k * Dp:k * Dp + D].set(
            params["w_hh"][:, k * D:(k + 1) * D])
        b_l = b_l.at[:, k * Dp:k * Dp + D].set(
            params["b_lstm"][:, k * D:(k + 1) * D])

    w_out = jnp.zeros((Dp, Vp), jnp.float32).at[:D, :vocab].set(params["w_out"])
    b_out = jnp.zeros((1, Vp), jnp.float32).at[:, :vocab].set(params["b_out"])

    return dict(w_enc=w_enc, b_enc=b_enc, gw=gw, gb=gb, att=att, lw_b=lw_b,
                emb_table=emb_table, w_ih=w_ih, w_hh=w_hh, b_lstm=b_l,
                w_out=w_out, b_out=b_out)


# ----------------------------------------------------------------------------
# Full forward (thin jitted JAX glue around the single fused kernel)
# ----------------------------------------------------------------------------
@functools.partial(jax.jit,
                   static_argnames=("depth", "dim_h", "vocab", "training"))
def model_forward(pp, node_feats, adj, labels, *, depth, dim_h, vocab,
                  training=True):
    B, N, _f_in = node_feats.shape
    Fp = pp["w_enc"].shape[0]
    T = labels.shape[1]

    x_pad = _pad_last(node_feats.astype(jnp.float32), Fp)           # (B,N,Fp)

    # Block-diagonal adjacency: turns per-graph aggregation into a single
    # (BN,BN) @ (BN,Dp) MXU matmul inside the kernel.
    eye_b = jnp.eye(B, dtype=jnp.float32)
    adjf = adj.astype(jnp.float32)
    adj_blk = (eye_b[:, None, :, None] * adjf[:, :, None, :]
               ).reshape(B * N, B * N)

    # Teacher-forced token embeddings (SOS = 0), pre-gathered into one slab.
    prev_tok = jnp.concatenate(
        [jnp.zeros((B, 1), labels.dtype), labels[:, :-1]], axis=1)
    x_seq = jnp.take(pp["emb_table"], prev_tok, axis=0)              # (B,T,Dp)
    x_seq = jnp.transpose(x_seq, (1, 0, 2))                          # (T,B,Dp)

    logits_pad = fused_forward(x_pad, adj_blk, x_seq, pp,
                               depth=depth, d_real=dim_h,
                               B=B, N=N, T=T)                        # (T,B,Vp)
    predictions = jnp.transpose(logits_pad, (1, 0, 2))[:, :, :vocab]  # (B,T,V)
    cl_loss = jnp.float32(0.0)
    return predictions, cl_loss


if __name__ == "__main__":
    batch_size = 2
    num_nodes = 8
    f_in = 16
    dim_h = 32
    depth = 2
    max_seq_len = 4
    vocab = 16

    key = jax.random.PRNGKey(0)
    k_x, k_a, k_lab = jax.random.split(key, 3)

    node_feats = jax.random.normal(k_x, (batch_size, num_nodes, f_in),
                                   jnp.float32)
    adj_raw = (jax.random.uniform(k_a, (batch_size, num_nodes, num_nodes))
               > 0.6).astype(jnp.float32)
    adj_raw = adj_raw + jnp.eye(num_nodes, dtype=jnp.float32)[None]
    adj = adj_raw / jnp.sum(adj_raw, axis=-1, keepdims=True)
    labels = jax.random.randint(k_lab, (batch_size, max_seq_len), 0, vocab,
                                dtype=jnp.int32)

    params = make_params(jax.random.PRNGKey(42), f_in, dim_h, depth, vocab)
    padded = pad_params(params, f_in, dim_h, depth, vocab)   # once, offline

    predictions, cl_loss = model_forward(padded, node_feats, adj, labels,
                                         depth=depth, dim_h=dim_h,
                                         vocab=vocab, training=True)
    jax.block_until_ready((predictions, cl_loss))

    assert predictions.shape == (batch_size, max_seq_len, vocab)
    assert cl_loss.shape == ()
    print("KERNEL_OK")
</pallas_src>

<mosaic_0001>
module attributes {stable_mosaic.version = 11 : i64} {
  func.func @_fused_forward_kernel(%arg0: memref<2x8x128xf32, #tpu.memory_space<vmem>>, %arg1: memref<16x16xf32, #tpu.memory_space<vmem>>, %arg2: memref<4x2x128xf32, #tpu.memory_space<vmem>>, %arg3: memref<128x128xf32, #tpu.memory_space<vmem>>, %arg4: memref<1x128xf32, #tpu.memory_space<vmem>>, %arg5: memref<2x128x128xf32, #tpu.memory_space<vmem>>, %arg6: memref<2x1x128xf32, #tpu.memory_space<vmem>>, %arg7: memref<3x128xf32, #tpu.memory_space<vmem>>, %arg8: memref<3x128xf32, #tpu.memory_space<vmem>>, %arg9: memref<128x512xf32, #tpu.memory_space<vmem>>, %arg10: memref<128x512xf32, #tpu.memory_space<vmem>>, %arg11: memref<1x512xf32, #tpu.memory_space<vmem>>, %arg12: memref<128x128xf32, #tpu.memory_space<vmem>>, %arg13: memref<1x128xf32, #tpu.memory_space<vmem>>, %arg14: memref<4x2x128xf32, #tpu.memory_space<vmem>>) attributes {dimension_semantics = [], scalar_prefetch = 0 : i64, scratch_operands = 0 : i64, tpu.core_type = #tpu.core_type<tc>} {
    %0 = tpu.iota {dimensions = array<i32: 1>} : vector<1x128xi32>
    %c32_i32 = arith.constant 32 : i32
    %1 = vector.broadcast %c32_i32 : i32 to vector<1x128xi32>
    %2 = arith.cmpi slt, %0, %1 : vector<1x128xi32>
    %3 = arith.extui %2 : vector<1x128xi1> to vector<1x128xi32>
    %4 = arith.sitofp %3 : vector<1x128xi32> to vector<1x128xf32>
    %c0 = arith.constant 0 : index
    %c0_0 = arith.constant 0 : index
    %5 = vector.load %arg7[%c0, %c0_0] : memref<3x128xf32, #tpu.memory_space<vmem>>, vector<3x128xf32>
    %c0_1 = arith.constant 0 : index
    %c0_2 = arith.constant 0 : index
    %6 = vector.load %arg8[%c0_1, %c0_2] : memref<3x128xf32, #tpu.memory_space<vmem>>, vector<3x128xf32>
    %c0_3 = arith.constant 0 : index
    %c0_4 = arith.constant 0 : index
    %c0_5 = arith.constant 0 : index
    %7 = vector.load %arg0[%c0_3, %c0_4, %c0_5] : memref<2x8x128xf32, #tpu.memory_space<vmem>>, vector<2x8x128xf32>
    %8 = vector.shape_cast %7 : vector<2x8x128xf32> to vector<16x128xf32>
    %c0_6 = arith.constant 0 : index
    %c0_7 = arith.constant 0 : index
    %9 = vector.load %arg3[%c0_6, %c0_7] : memref<128x128xf32, #tpu.memory_space<vmem>>, vector<128x128xf32>
    %cst = arith.constant dense<0.000000e+00> : vector<16x128xf32>
    %10 = tpu.matmul %8, %9, %cst {dimension_numbers = #tpu.dot_dimension_numbers<[1], [0], [0], [1], [0, 0, 1, 1], [], []>} : vector<16x128xf32>, vector<128x128xf32>, vector<16x128xf32> -> vector<16x128xf32>
    %c0_8 = arith.constant 0 : index
    %c0_9 = arith.constant 0 : index
    %11 = vector.load %arg4[%c0_8, %c0_9] : memref<1x128xf32, #tpu.memory_space<vmem>>, vector<1x128xf32>
    %12 = vector.broadcast %11 : vector<1x128xf32> to vector<16x128xf32>
    %13 = arith.addf %10, %12 : vector<16x128xf32>
    %cst_10 = arith.constant 0.000000e+00 : f32
    %14 = vector.broadcast %cst_10 : f32 to vector<16x128xf32>
    %15 = arith.maximumf %13, %14 : vector<16x128xf32>
    %cst_11 = arith.constant 0.000000e+00 : f32
    %16 = vector.broadcast %cst_11 : f32 to vector<2x128xf32>
    %17 = vector.shape_cast %15 : vector<16x128xf32> to vector<2x8x128xf32>
    %18 = vector.extract_strided_slice %5 {offsets = [0, 0], sizes = [1, 128], strides = [1, 1]} : vector<3x128xf32> to vector<1x128xf32>
    %19 = vector.shape_cast %18 : vector<1x128xf32> to vector<1x1x128xf32>
    %20 = vector.broadcast %19 : vector<1x1x128xf32> to vector<2x8x128xf32>
    %21 = arith.mulf %17, %20 : vector<2x8x128xf32>
    %cst_12 = arith.constant dense<0.000000e+00> : vector<2x8xf32>
    %22 = vector.multi_reduction <add>, %21, %cst_12 [2] : vector<2x8x128xf32> to vector<2x8xf32>
    %cst_13 = arith.constant dense<0xFF800000> : vector<2xf32>
    %23 = vector.multi_reduction <maximumf>, %22, %cst_13 [1] : vector<2x8xf32> to vector<2xf32>
    %24 = vector.shape_cast %23 : vector<2xf32> to vector<2x1xf32>
    %25 = vector.broadcast %24 : vector<2x1xf32> to vector<2x8xf32>
    %26 = arith.subf %22, %25 : vector<2x8xf32>
    %27 = math.exp %26 : vector<2x8xf32>
    %cst_14 = arith.constant dense<0.000000e+00> : vector<2xf32>
    %28 = vector.multi_reduction <add>, %27, %cst_14 [1] : vector<2x8xf32> to vector<2xf32>
    %29 = vector.shape_cast %28 : vector<2xf32> to vector<2x1xf32>
    %30 = vector.broadcast %29 : vector<2x1xf32> to vector<2x8xf32>
    %31 = arith.divf %27, %30 : vector<2x8xf32>
    %32 = vector.shape_cast %31 : vector<2x8xf32> to vector<2x1x8xf32>
    "tpu.trace_start"() <{level = 10 : i32, message = "bqn,bnd->bqd"}> : () -> ()
    %cst_15 = arith.constant dense<0.000000e+00> : vector<2x1x128xf32>
    %33 = tpu.matmul %32, %17, %cst_15 {dimension_numbers = #tpu.dot_dimension_numbers<[2], [1], [1], [2], [0, 0, 0, 1, 1, 2], [0], [0]>} : vector<2x1x8xf32>, vector<2x8x128xf32>, vector<2x1x128xf32> -> vector<2x1x128xf32>
    "tpu.trace_stop"() : () -> ()
    %34 = vector.shape_cast %33 : vector<2x1x128xf32> to vector<2x128xf32>
    %35 = vector.extract_strided_slice %6 {offsets = [0, 0], sizes = [1, 128], strides = [1, 1]} : vector<3x128xf32> to vector<1x128xf32>
    %36 = vector.broadcast %35 : vector<1x128xf32> to vector<2x128xf32>
    %37 = arith.mulf %36, %34 : vector<2x128xf32>
    %38 = arith.addf %16, %37 : vector<2x128xf32>
    %c0_16 = arith.constant 0 : index
    %c0_17 = arith.constant 0 : index
    %39 = vector.load %arg1[%c0_16, %c0_17] : memref<16x16xf32, #tpu.memory_space<vmem>>, vector<16x16xf32>
    %cst_18 = arith.constant dense<0.000000e+00> : vector<16x128xf32>
    %40 = tpu.matmul %39, %15, %cst_18 {dimension_numbers = #tpu.dot_dimension_numbers<[1], [0], [0], [1], [0, 0, 1, 1], [], []>} : vector<16x16xf32>, vector<16x128xf32>, vector<16x128xf32> -> vector<16x128xf32>
    %c0_19 = arith.constant 0 : index
    %c0_20 = arith.constant 0 : index
    %c0_21 = arith.constant 0 : index
    %41 = vector.load %arg5[%c0_19, %c0_20, %c0_21] : memref<2x128x128xf32, #tpu.memory_space<vmem>>, vector<1x128x128xf32>
    %42 = vector.shape_cast %41 : vector<1x128x128xf32> to vector<128x128xf32>
    %cst_22 = arith.constant dense<0.000000e+00> : vector<16x128xf32>
    %43 = tpu.matmul %40, %42, %cst_22 {dimension_numbers = #tpu.dot_dimension_numbers<[1], [0], [0], [1], [0, 0, 1, 1], [], []>} : vector<16x128xf32>, vector<128x128xf32>, vector<16x128xf32> -> vector<16x128xf32>
    %c0_23 = arith.constant 0 : index
    %c0_24 = arith.constant 0 : index
    %c0_25 = arith.constant 0 : index
    %44 = vector.load %arg6[%c0_23, %c0_24, %c0_25] : memref<2x1x128xf32, #tpu.memory_space<vmem>>, vector<1x1x128xf32>
    %45 = vector.shape_cast %44 : vector<1x1x128xf32> to vector<1x128xf32>
    %46 = vector.broadcast %45 : vector<1x128xf32> to vector<16x128xf32>
    %47 = arith.addf %43, %46 : vector<16x128xf32>
    %48 = vector.broadcast %4 : vector<1x128xf32> to vector<16x128xf32>
    %49 = arith.mulf %47, %48 : vector<16x128xf32>
    %cst_26 = arith.constant dense<0.000000e+00> : vector<16xf32>
    %50 = vector.multi_reduction <add>, %49, %cst_26 [1] : vector<16x128xf32> to vector<16xf32>
    %51 = vector.shape_cast %50 : vector<16xf32> to vector<16x1xf32>
    %cst_27 = arith.constant 3.125000e-02 : f32
    %52 = vector.broadcast %cst_27 : f32 to vector<16x1xf32>
    %53 = arith.mulf %51, %52 : vector<16x1xf32>
    %54 = vector.broadcast %53 : vector<16x1xf32> to vector<16x128xf32>
    %55 = arith.subf %47, %54 : vector<16x128xf32>
    %56 = vector.broadcast %4 : vector<1x128xf32> to vector<16x128xf32>
    %57 = arith.mulf %55, %56 : vector<16x128xf32>
    %58 = arith.mulf %57, %57 : vector<16x128xf32>
    %cst_28 = arith.constant dense<0.000000e+00> : vector<16xf32>
    %59 = vector.multi_reduction <add>, %58, %cst_28 [1] : vector<16x128xf32> to vector<16xf32>
    %60 = vector.shape_cast %59 : vector<16xf32> to vector<16x1xf32>
    %cst_29 = arith.constant 3.125000e-02 : f32
    %61 = vector.broadcast %cst_29 : f32 to vector<16x1xf32>
    %62 = arith.mulf %60, %61 : vector<16x1xf32>
    %cst_30 = arith.constant 9.99999974E-6 : f32
    %63 = vector.broadcast %cst_30 : f32 to vector<16x1xf32>
    %64 = arith.addf %62, %63 : vector<16x1xf32>
    %65 = math.rsqrt %64 : vector<16x1xf32>
    %66 = vector.broadcast %65 : vector<16x1xf32> to vector<16x128xf32>
    %67 = arith.mulf %57, %66 : vector<16x128xf32>
    %cst_31 = arith.constant 0.000000e+00 : f32
    %68 = vector.broadcast %cst_31 : f32 to vector<16x128xf32>
    %69 = arith.maximumf %67, %68 : vector<16x128xf32>
    %70 = arith.addf %69, %15 : vector<16x128xf32>
    %71 = vector.shape_cast %70 : vector<16x128xf32> to vector<2x8x128xf32>
    %72 = vector.extract_strided_slice %5 {offsets = [1, 0], sizes = [1, 128], strides = [1, 1]} : vector<3x128xf32> to vector<1x128xf32>
    %73 = vector.shape_cast %72 : vector<1x128xf32> to vector<1x1x128xf32>
    %74 = vector.broadcast %73 : vector<1x1x128xf32> to vector<2x8x128xf32>
    %75 = arith.mulf %71, %74 : vector<2x8x128xf32>
    %cst_32 = arith.constant dense<0.000000e+00> : vector<2x8xf32>
    %76 = vector.multi_reduction <add>, %75, %cst_32 [2] : vector<2x8x128xf32> to vector<2x8xf32>
    %cst_33 = arith.constant dense<0xFF800000> : vector<2xf32>
    %77 = vector.multi_reduction <maximumf>, %76, %cst_33 [1] : vector<2x8xf32> to vector<2xf32>
    %78 = vector.shape_cast %77 : vector<2xf32> to vector<2x1xf32>
    %79 = vector.broadcast %78 : vector<2x1xf32> to vector<2x8xf32>
    %80 = arith.subf %76, %79 : vector<2x8xf32>
    %81 = math.exp %80 : vector<2x8xf32>
    %cst_34 = arith.constant dense<0.000000e+00> : vector<2xf32>
    %82 = vector.multi_reduction <add>, %81, %cst_34 [1] : vector<2x8xf32> to vector<2xf32>
    %83 = vector.shape_cast %82 : vector<2xf32> to vector<2x1xf32>
    %84 = vector.broadcast %83 : vector<2x1xf32> to vector<2x8xf32>
    %85 = arith.divf %81, %84 : vector<2x8xf32>
    %86 = vector.shape_cast %85 : vector<2x8xf32> to vector<2x1x8xf32>
    "tpu.trace_start"() <{level = 10 : i32, message = "bqn,bnd->bqd"}> : () -> ()
    %cst_35 = arith.constant dense<0.000000e+00> : vector<2x1x128xf32>
    %87 = tpu.matmul %86, %71, %cst_35 {dimension_numbers = #tpu.dot_dimension_numbers<[2], [1], [1], [2], [0, 0, 0, 1, 1, 2], [0], [0]>} : vector<2x1x8xf32>, vector<2x8x128xf32>, vector<2x1x128xf32> -> vector<2x1x128xf32>
    "tpu.trace_stop"() : () -> ()
    %88 = vector.shape_cast %87 : vector<2x1x128xf32> to vector<2x128xf32>
    %89 = vector.extract_strided_slice %6 {offsets = [1, 0], sizes = [1, 128], strides = [1, 1]} : vector<3x128xf32> to vector<1x128xf32>
    %90 = vector.broadcast %89 : vector<1x128xf32> to vector<2x128xf32>
    %91 = arith.mulf %90, %88 : vector<2x128xf32>
    %92 = arith.addf %38, %91 : vector<2x128xf32>
    %cst_36 = arith.constant dense<0.000000e+00> : vector<16x128xf32>
    %93 = tpu.matmul %39, %70, %cst_36 {dimension_numbers = #tpu.dot_dimension_numbers<[1], [0], [0], [1], [0, 0, 1, 1], [], []>} : vector<16x16xf32>, vector<16x128xf32>, vector<16x128xf32> -> vector<16x128xf32>
    %c1 = arith.constant 1 : index
    %c0_37 = arith.constant 0 : index
    %c0_38 = arith.constant 0 : index
    %94 = vector.load %arg5[%c1, %c0_37, %c0_38] : memref<2x128x128xf32, #tpu.memory_space<vmem>>, vector<1x128x128xf32>
    %95 = vector.shape_cast %94 : vector<1x128x128xf32> to vector<128x128xf32>
    %cst_39 = arith.constant dense<0.000000e+00> : vector<16x128xf32>
    %96 = tpu.matmul %93, %95, %cst_39 {dimension_numbers = #tpu.dot_dimension_numbers<[1], [0], [0], [1], [0, 0, 1, 1], [], []>} : vector<16x128xf32>, vector<128x128xf32>, vector<16x128xf32> -> vector<16x128xf32>
    %c1_40 = arith.constant 1 : index
    %c0_41 = arith.constant 0 : index
    %c0_42 = arith.constant 0 : index
    %97 = vector.load %arg6[%c1_40, %c0_41, %c0_42] : memref<2x1x128xf32, #tpu.memory_space<vmem>>, vector<1x1x128xf32>
    %98 = vector.shape_cast %97 : vector<1x1x128xf32> to vector<1x128xf32>
    %99 = vector.broadcast %98 : vector<1x128xf32> to vector<16x128xf32>
    %100 = arith.addf %96, %99 : vector<16x128xf32>
    %101 = vector.broadcast %4 : vector<1x128xf32> to vector<16x128xf32>
    %102 = arith.mulf %100, %101 : vector<16x128xf32>
    %cst_43 = arith.constant dense<0.000000e+00> : vector<16xf32>
    %103 = vector.multi_reduction <add>, %102, %cst_43 [1] : vector<16x128xf32> to vector<16xf32>
    %104 = vector.shape_cast %103 : vector<16xf32> to vector<16x1xf32>
    %cst_44 = arith.constant 3.125000e-02 : f32
    %105 = vector.broadcast %cst_44 : f32 to vector<16x1xf32>
    %106 = arith.mulf %104, %105 : vector<16x1xf32>
    %107 = vector.broadcast %106 : vector<16x1xf32> to vector<16x128xf32>
    %108 = arith.subf %100, %107 : vector<16x128xf32>
    %109 = vector.broadcast %4 : vector<1x128xf32> to vector<16x128xf32>
    %110 = arith.mulf %108, %109 : vector<16x128xf32>
    %111 = arith.mulf %110, %110 : vector<16x128xf32>
    %cst_45 = arith.constant dense<0.000000e+00> : vector<16xf32>
    %112 = vector.multi_reduction <add>, %111, %cst_45 [1] : vector<16x128xf32> to vector<16xf32>
    %113 = vector.shape_cast %112 : vector<16xf32> to vector<16x1xf32>
    %cst_46 = arith.constant 3.125000e-02 : f32
    %114 = vector.broadcast %cst_46 : f32 to vector<16x1xf32>
    %115 = arith.mulf %113, %114 : vector<16x1xf32>
    %cst_47 = arith.constant 9.99999974E-6 : f32
    %116 = vector.broadcast %cst_47 : f32 to vector<16x1xf32>
    %117 = arith.addf %115, %116 : vector<16x1xf32>
    %118 = math.rsqrt %117 : vector<16x1xf32>
    %119 = vector.broadcast %118 : vector<16x1xf32> to vector<16x128xf32>
    %120 = arith.mulf %110, %119 : vector<16x128xf32>
    %cst_48 = arith.constant 0.000000e+00 : f32
    %121 = vector.broadcast %cst_48 : f32 to vector<16x128xf32>
    %122 = arith.maximumf %120, %121 : vector<16x128xf32>
    %123 = arith.addf %122, %70 : vector<16x128xf32>
    %124 = vector.shape_cast %123 : vector<16x128xf32> to vector<2x8x128xf32>
    %125 = vector.extract_strided_slice %5 {offsets = [2, 0], sizes = [1, 128], strides = [1, 1]} : vector<3x128xf32> to vector<1x128xf32>
    %126 = vector.shape_cast %125 : vector<1x128xf32> to vector<1x1x128xf32>
    %127 = vector.broadcast %126 : vector<1x1x128xf32> to vector<2x8x128xf32>
    %128 = arith.mulf %124, %127 : vector<2x8x128xf32>
    %cst_49 = arith.constant dense<0.000000e+00> : vector<2x8xf32>
    %129 = vector.multi_reduction <add>, %128, %cst_49 [2] : vector<2x8x128xf32> to vector<2x8xf32>
    %cst_50 = arith.constant dense<0xFF800000> : vector<2xf32>
    %130 = vector.multi_reduction <maximumf>, %129, %cst_50 [1] : vector<2x8xf32> to vector<2xf32>
    %131 = vector.shape_cast %130 : vector<2xf32> to vector<2x1xf32>
    %132 = vector.broadcast %131 : vector<2x1xf32> to vector<2x8xf32>
    %133 = arith.subf %129, %132 : vector<2x8xf32>
    %134 = math.exp %133 : vector<2x8xf32>
    %cst_51 = arith.constant dense<0.000000e+00> : vector<2xf32>
    %135 = vector.multi_reduction <add>, %134, %cst_51 [1] : vector<2x8xf32> to vector<2xf32>
    %136 = vector.shape_cast %135 : vector<2xf32> to vector<2x1xf32>
    %137 = vector.broadcast %136 : vector<2x1xf32> to vector<2x8xf32>
    %138 = arith.divf %134, %137 : vector<2x8xf32>
    %139 = vector.shape_cast %138 : vector<2x8xf32> to vector<2x1x8xf32>
    "tpu.trace_start"() <{level = 10 : i32, message = "bqn,bnd->bqd"}> : () -> ()
    %cst_52 = arith.constant dense<0.000000e+00> : vector<2x1x128xf32>
    %140 = tpu.matmul %139, %124, %cst_52 {dimension_numbers = #tpu.dot_dimension_numbers<[2], [1], [1], [2], [0, 0, 0, 1, 1, 2], [0], [0]>} : vector<2x1x8xf32>, vector<2x8x128xf32>, vector<2x1x128xf32> -> vector<2x1x128xf32>
    "tpu.trace_stop"() : () -> ()
    %141 = vector.shape_cast %140 : vector<2x1x128xf32> to vector<2x128xf32>
    %142 = vector.extract_strided_slice %6 {offsets = [2, 0], sizes = [1, 128], strides = [1, 1]} : vector<3x128xf32> to vector<1x128xf32>
    %143 = vector.broadcast %142 : vector<1x128xf32> to vector<2x128xf32>
    %144 = arith.mulf %143, %141 : vector<2x128xf32>
    %145 = arith.addf %92, %144 : vector<2x128xf32>
    %c0_53 = arith.constant 0 : index
    %c0_54 = arith.constant 0 : index
    %146 = vector.load %arg9[%c0_53, %c0_54] : memref<128x512xf32, #tpu.memory_space<vmem>>, vector<128x512xf32>
    %c0_55 = arith.constant 0 : index
    %c0_56 = arith.constant 0 : index
    %147 = vector.load %arg10[%c0_55, %c0_56] : memref<128x512xf32, #tpu.memory_space<vmem>>, vector<128x512xf32>
    %c0_57 = arith.constant 0 : index
    %c0_58 = arith.constant 0 : index
    %148 = vector.load %arg11[%c0_57, %c0_58] : memref<1x512xf32, #tpu.memory_space<vmem>>, vector<1x512xf32>
    %c0_59 = arith.constant 0 : index
    %c0_60 = arith.constant 0 : index
    %149 = vector.load %arg12[%c0_59, %c0_60] : memref<128x128xf32, #tpu.memory_space<vmem>>, vector<128x128xf32>
    %c0_61 = arith.constant 0 : index
    %c0_62 = arith.constant 0 : index
    %150 = vector.load %arg13[%c0_61, %c0_62] : memref<1x128xf32, #tpu.memory_space<vmem>>, vector<1x128xf32>
    %cst_63 = arith.constant 0.000000e+00 : f32
    %151 = vector.broadcast %cst_63 : f32 to vector<2x128xf32>
    %c0_64 = arith.constant 0 : index
    %c0_65 = arith.constant 0 : index
    %c0_66 = arith.constant 0 : index
    %152 = vector.load %arg2[%c0_64, %c0_65, %c0_66] : memref<4x2x128xf32, #tpu.memory_space<vmem>>, vector<1x2x128xf32>
    %153 = vector.shape_cast %152 : vector<1x2x128xf32> to vector<2x128xf32>
    %cst_67 = arith.constant dense<0.000000e+00> : vector<2x512xf32>
    %154 = tpu.matmul %153, %146, %cst_67 {dimension_numbers = #tpu.dot_dimension_numbers<[1], [0], [0], [1], [0, 0, 1, 1], [], []>} : vector<2x128xf32>, vector<128x512xf32>, vector<2x512xf32> -> vector<2x512xf32>
    %cst_68 = arith.constant dense<0.000000e+00> : vector<2x512xf32>
    %155 = tpu.matmul %145, %147, %cst_68 {dimension_numbers = #tpu.dot_dimension_numbers<[1], [0], [0], [1], [0, 0, 1, 1], [], []>} : vector<2x128xf32>, vector<128x512xf32>, vector<2x512xf32> -> vector<2x512xf32>
    %156 = arith.addf %154, %155 : vector<2x512xf32>
    %157 = vector.broadcast %148 : vector<1x512xf32> to vector<2x512xf32>
    %158 = arith.addf %156, %157 : vector<2x512xf32>
    %159 = vector.extract_strided_slice %158 {offsets = [0, 0], sizes = [2, 128], strides = [1, 1]} : vector<2x512xf32> to vector<2x128xf32>
    %160 = arith.negf %159 : vector<2x128xf32>
    %161 = math.exp %160 : vector<2x128xf32>
    %cst_69 = arith.constant 1.000000e+00 : f32
    %162 = vector.broadcast %cst_69 : f32 to vector<2x128xf32>
    %163 = arith.addf %162, %161 : vector<2x128xf32>
    %164 = arith.divf %162, %163 : vector<2x128xf32>
    %165 = vector.extract_strided_slice %158 {offsets = [0, 128], sizes = [2, 128], strides = [1, 1]} : vector<2x512xf32> to vector<2x128xf32>
    %166 = arith.negf %165 : vector<2x128xf32>
    %167 = math.exp %166 : vector<2x128xf32>
    %cst_70 = arith.constant 1.000000e+00 : f32
    %168 = vector.broadcast %cst_70 : f32 to vector<2x128xf32>
    %169 = arith.addf %168, %167 : vector<2x128xf32>
    %170 = arith.divf %168, %169 : vector<2x128xf32>
    %171 = vector.extract_strided_slice %158 {offsets = [0, 256], sizes = [2, 128], strides = [1, 1]} : vector<2x512xf32> to vector<2x128xf32>
    %172 = math.tanh %171 : vector<2x128xf32>
    %173 = vector.extract_strided_slice %158 {offsets = [0, 384], sizes = [2, 128], strides = [1, 1]} : vector<2x512xf32> to vector<2x128xf32>
    %174 = arith.negf %173 : vector<2x128xf32>
    %175 = math.exp %174 : vector<2x128xf32>
    %cst_71 = arith.constant 1.000000e+00 : f32
    %176 = vector.broadcast %cst_71 : f32 to vector<2x128xf32>
    %177 = arith.addf %176, %175 : vector<2x128xf32>
    %178 = arith.divf %176, %177 : vector<2x128xf32>
    %179 = arith.mulf %170, %151 : vector<2x128xf32>
    %180 = arith.mulf %164, %172 : vector<2x128xf32>
    %181 = arith.addf %179, %180 : vector<2x128xf32>
    %182 = math.tanh %181 : vector<2x128xf32>
    %183 = arith.mulf %178, %182 : vector<2x128xf32>
    %cst_72 = arith.constant dense<0.000000e+00> : vector<2x128xf32>
    %184 = tpu.matmul %183, %149, %cst_72 {dimension_numbers = #tpu.dot_dimension_numbers<[1], [0], [0], [1], [0, 0, 1, 1], [], []>} : vector<2x128xf32>, vector<128x128xf32>, vector<2x128xf32> -> vector<2x128xf32>
    %185 = vector.broadcast %150 : vector<1x128xf32> to vector<2x128xf32>
    %186 = arith.addf %184, %185 : vector<2x128xf32>
    %c0_73 = arith.constant 0 : index
    %c0_74 = arith.constant 0 : index
    %c0_75 = arith.constant 0 : index
    %187 = vector.load %arg14[%c0_73, %c0_74, %c0_75] : memref<4x2x128xf32, #tpu.memory_space<vmem>>, vector<1x2x128xf32>
    %188 = vector.shape_cast %187 : vector<1x2x128xf32> to vector<2x128xf32>
    %189 = vector.shape_cast %186 : vector<2x128xf32> to vector<1x2x128xf32>
    tpu.vector_store %arg14[%c0_73, %c0_74, %c0_75], %189 {strides = array<i32>} : memref<4x2x128xf32, #tpu.memory_space<vmem>>, vector<1x2x128xf32>,
    %c1_76 = arith.constant 1 : index
    %c0_77 = arith.constant 0 : index
    %c0_78 = arith.constant 0 : index
    %190 = vector.load %arg2[%c1_76, %c0_77, %c0_78] : memref<4x2x128xf32, #tpu.memory_space<vmem>>, vector<1x2x128xf32>
    %191 = vector.shape_cast %190 : vector<1x2x128xf32> to vector<2x128xf32>
    %cst_79 = arith.constant dense<0.000000e+00> : vector<2x512xf32>
    %192 = tpu.matmul %191, %146, %cst_79 {dimension_numbers = #tpu.dot_dimension_numbers<[1], [0], [0], [1], [0, 0, 1, 1], [], []>} : vector<2x128xf32>, vector<128x512xf32>, vector<2x512xf32> -> vector<2x512xf32>
    %cst_80 = arith.constant dense<0.000000e+00> : vector<2x512xf32>
    %193 = tpu.matmul %183, %147, %cst_80 {dimension_numbers = #tpu.dot_dimension_numbers<[1], [0], [0], [1], [0, 0, 1, 1], [], []>} : vector<2x128xf32>, vector<128x512xf32>, vector<2x512xf32> -> vector<2x512xf32>
    %194 = arith.addf %192, %193 : vector<2x512xf32>
    %195 = vector.broadcast %148 : vector<1x512xf32> to vector<2x512xf32>
    %196 = arith.addf %194, %195 : vector<2x512xf32>
    %197 = vector.extract_strided_slice %196 {offsets = [0, 0], sizes = [2, 128], strides = [1, 1]} : vector<2x512xf32> to vector<2x128xf32>
    %198 = arith.negf %197 : vector<2x128xf32>
    %199 = math.exp %198 : vector<2x128xf32>
    %cst_81 = arith.constant 1.000000e+00 : f32
    %200 = vector.broadcast %cst_81 : f32 to vector<2x128xf32>
    %201 = arith.addf %200, %199 : vector<2x128xf32>
    %202 = arith.divf %200, %201 : vector<2x128xf32>
    %203 = vector.extract_strided_slice %196 {offsets = [0, 128], sizes = [2, 128], strides = [1, 1]} : vector<2x512xf32> to vector<2x128xf32>
    %204 = arith.negf %203 : vector<2x128xf32>
    %205 = math.exp %204 : vector<2x128xf32>
    %cst_82 = arith.constant 1.000000e+00 : f32
    %206 = vector.broadcast %cst_82 : f32 to vector<2x128xf32>
    %207 = arith.addf %206, %205 : vector<2x128xf32>
    %208 = arith.divf %206, %207 : vector<2x128xf32>
    %209 = vector.extract_strided_slice %196 {offsets = [0, 256], sizes = [2, 128], strides = [1, 1]} : vector<2x512xf32> to vector<2x128xf32>
    %210 = math.tanh %209 : vector<2x128xf32>
    %211 = vector.extract_strided_slice %196 {offsets = [0, 384], sizes = [2, 128], strides = [1, 1]} : vector<2x512xf32> to vector<2x128xf32>
    %212 = arith.negf %211 : vector<2x128xf32>
    %213 = math.exp %212 : vector<2x128xf32>
    %cst_83 = arith.constant 1.000000e+00 : f32
    %214 = vector.broadcast %cst_83 : f32 to vector<2x128xf32>
    %215 = arith.addf %214, %213 : vector<2x128xf32>
    %216 = arith.divf %214, %215 : vector<2x128xf32>
    %217 = arith.mulf %208, %181 : vector<2x128xf32>
    %218 = arith.mulf %202, %210 : vector<2x128xf32>
    %219 = arith.addf %217, %218 : vector<2x128xf32>
    %220 = math.tanh %219 : vector<2x128xf32>
    %221 = arith.mulf %216, %220 : vector<2x128xf32>
    %cst_84 = arith.constant dense<0.000000e+00> : vector<2x128xf32>
    %222 = tpu.matmul %221, %149, %cst_84 {dimension_numbers = #tpu.dot_dimension_numbers<[1], [0], [0], [1], [0, 0, 1, 1], [], []>} : vector<2x128xf32>, vector<128x128xf32>, vector<2x128xf32> -> vector<2x128xf32>
    %223 = vector.broadcast %150 : vector<1x128xf32> to vector<2x128xf32>
    %224 = arith.addf %222, %223 : vector<2x128xf32>
    %c1_85 = arith.constant 1 : index
    %c0_86 = arith.constant 0 : index
    %c0_87 = arith.constant 0 : index
    %225 = vector.load %arg14[%c1_85, %c0_86, %c0_87] : memref<4x2x128xf32, #tpu.memory_space<vmem>>, vector<1x2x128xf32>
    %226 = vector.shape_cast %225 : vector<1x2x128xf32> to vector<2x128xf32>
    %227 = vector.shape_cast %224 : vector<2x128xf32> to vector<1x2x128xf32>
    tpu.vector_store %arg14[%c1_85, %c0_86, %c0_87], %227 {strides = array<i32>} : memref<4x2x128xf32, #tpu.memory_space<vmem>>, vector<1x2x128xf32>,
    %c2 = arith.constant 2 : index
    %c0_88 = arith.constant 0 : index
    %c0_89 = arith.constant 0 : index
    %228 = vector.load %arg2[%c2, %c0_88, %c0_89] : memref<4x2x128xf32, #tpu.memory_space<vmem>>, vector<1x2x128xf32>
    %229 = vector.shape_cast %228 : vector<1x2x128xf32> to vector<2x128xf32>
    %cst_90 = arith.constant dense<0.000000e+00> : vector<2x512xf32>
    %230 = tpu.matmul %229, %146, %cst_90 {dimension_numbers = #tpu.dot_dimension_numbers<[1], [0], [0], [1], [0, 0, 1, 1], [], []>} : vector<2x128xf32>, vector<128x512xf32>, vector<2x512xf32> -> vector<2x512xf32>
    %cst_91 = arith.constant dense<0.000000e+00> : vector<2x512xf32>
    %231 = tpu.matmul %221, %147, %cst_91 {dimension_numbers = #tpu.dot_dimension_numbers<[1], [0], [0], [1], [0, 0, 1, 1], [], []>} : vector<2x128xf32>, vector<128x512xf32>, vector<2x512xf32> -> vector<2x512xf32>
    %232 = arith.addf %230, %231 : vector<2x512xf32>
    %233 = vector.broadcast %148 : vector<1x512xf32> to vector<2x512xf32>
    %234 = arith.addf %232, %233 : vector<2x512xf32>
    %235 = vector.extract_strided_slice %234 {offsets = [0, 0], sizes = [2, 128], strides = [1, 1]} : vector<2x512xf32> to vector<2x128xf32>
    %236 = arith.negf %235 : vector<2x128xf32>
    %237 = math.exp %236 : vector<2x128xf32>
    %cst_92 = arith.constant 1.000000e+00 : f32
    %238 = vector.broadcast %cst_92 : f32 to vector<2x128xf32>
    %239 = arith.addf %238, %237 : vector<2x128xf32>
    %240 = arith.divf %238, %239 : vector<2x128xf32>
    %241 = vector.extract_strided_slice %234 {offsets = [0, 128], sizes = [2, 128], strides = [1, 1]} : vector<2x512xf32> to vector<2x128xf32>
    %242 = arith.negf %241 : vector<2x128xf32>
    %243 = math.exp %242 : vector<2x128xf32>
    %cst_93 = arith.constant 1.000000e+00 : f32
    %244 = vector.broadcast %cst_93 : f32 to vector<2x128xf32>
    %245 = arith.addf %244, %243 : vector<2x128xf32>
    %246 = arith.divf %244, %245 : vector<2x128xf32>
    %247 = vector.extract_strided_slice %234 {offsets = [0, 256], sizes = [2, 128], strides = [1, 1]} : vector<2x512xf32> to vector<2x128xf32>
    %248 = math.tanh %247 : vector<2x128xf32>
    %249 = vector.extract_strided_slice %234 {offsets = [0, 384], sizes = [2, 128], strides = [1, 1]} : vector<2x512xf32> to vector<2x128xf32>
    %250 = arith.negf %249 : vector<2x128xf32>
    %251 = math.exp %250 : vector<2x128xf32>
    %cst_94 = arith.constant 1.000000e+00 : f32
    %252 = vector.broadcast %cst_94 : f32 to vector<2x128xf32>
    %253 = arith.addf %252, %251 : vector<2x128xf32>
    %254 = arith.divf %252, %253 : vector<2x128xf32>
    %255 = arith.mulf %246, %219 : vector<2x128xf32>
    %256 = arith.mulf %240, %248 : vector<2x128xf32>
    %257 = arith.addf %255, %256 : vector<2x128xf32>
    %258 = math.tanh %257 : vector<2x128xf32>
    %259 = arith.mulf %254, %258 : vector<2x128xf32>
    %cst_95 = arith.constant dense<0.000000e+00> : vector<2x128xf32>
    %260 = tpu.matmul %259, %149, %cst_95 {dimension_numbers = #tpu.dot_dimension_numbers<[1], [0], [0], [1], [0, 0, 1, 1], [], []>} : vector<2x128xf32>, vector<128x128xf32>, vector<2x128xf32> -> vector<2x128xf32>
    %261 = vector.broadcast %150 : vector<1x128xf32> to vector<2x128xf32>
    %262 = arith.addf %260, %261 : vector<2x128xf32>
    %c2_96 = arith.constant 2 : index
    %c0_97 = arith.constant 0 : index
    %c0_98 = arith.constant 0 : index
    %263 = vector.load %arg14[%c2_96, %c0_97, %c0_98] : memref<4x2x128xf32, #tpu.memory_space<vmem>>, vector<1x2x128xf32>
    %264 = vector.shape_cast %263 : vector<1x2x128xf32> to vector<2x128xf32>
    %265 = vector.shape_cast %262 : vector<2x128xf32> to vector<1x2x128xf32>
    tpu.vector_store %arg14[%c2_96, %c0_97, %c0_98], %265 {strides = array<i32>} : memref<4x2x128xf32, #tpu.memory_space<vmem>>, vector<1x2x128xf32>,
    %c3 = arith.constant 3 : index
    %c0_99 = arith.constant 0 : index
    %c0_100 = arith.constant 0 : index
    %266 = vector.load %arg2[%c3, %c0_99, %c0_100] : memref<4x2x128xf32, #tpu.memory_space<vmem>>, vector<1x2x128xf32>
    %267 = vector.shape_cast %266 : vector<1x2x128xf32> to vector<2x128xf32>
    %cst_101 = arith.constant dense<0.000000e+00> : vector<2x512xf32>
    %268 = tpu.matmul %267, %146, %cst_101 {dimension_numbers = #tpu.dot_dimension_numbers<[1], [0], [0], [1], [0, 0, 1, 1], [], []>} : vector<2x128xf32>, vector<128x512xf32>, vector<2x512xf32> -> vector<2x512xf32>
    %cst_102 = arith.constant dense<0.000000e+00> : vector<2x512xf32>
    %269 = tpu.matmul %259, %147, %cst_102 {dimension_numbers = #tpu.dot_dimension_numbers<[1], [0], [0], [1], [0, 0, 1, 1], [], []>} : vector<2x128xf32>, vector<128x512xf32>, vector<2x512xf32> -> vector<2x512xf32>
    %270 = arith.addf %268, %269 : vector<2x512xf32>
    %271 = vector.broadcast %148 : vector<1x512xf32> to vector<2x512xf32>
    %272 = arith.addf %270, %271 : vector<2x512xf32>
    %273 = vector.extract_strided_slice %272 {offsets = [0, 0], sizes = [2, 128], strides = [1, 1]} : vector<2x512xf32> to vector<2x128xf32>
    %274 = arith.negf %273 : vector<2x128xf32>
    %275 = math.exp %274 : vector<2x128xf32>
    %cst_103 = arith.constant 1.000000e+00 : f32
    %276 = vector.broadcast %cst_103 : f32 to vector<2x128xf32>
    %277 = arith.addf %276, %275 : vector<2x128xf32>
    %278 = arith.divf %276, %277 : vector<2x128xf32>
    %279 = vector.extract_strided_slice %272 {offsets = [0, 128], sizes = [2, 128], strides = [1, 1]} : vector<2x512xf32> to vector<2x128xf32>
    %280 = arith.negf %279 : vector<2x128xf32>
    %281 = math.exp %280 : vector<2x128xf32>
    %cst_104 = arith.constant 1.000000e+00 : f32
    %282 = vector.broadcast %cst_104 : f32 to vector<2x128xf32>
    %283 = arith.addf %282, %281 : vector<2x128xf32>
    %284 = arith.divf %282, %283 : vector<2x128xf32>
    %285 = vector.extract_strided_slice %272 {offsets = [0, 256], sizes = [2, 128], strides = [1, 1]} : vector<2x512xf32> to vector<2x128xf32>
    %286 = math.tanh %285 : vector<2x128xf32>
    %287 = vector.extract_strided_slice %272 {offsets = [0, 384], sizes = [2, 128], strides = [1, 1]} : vector<2x512xf32> to vector<2x128xf32>
    %288 = arith.negf %287 : vector<2x128xf32>
    %289 = math.exp %288 : vector<2x128xf32>
    %cst_105 = arith.constant 1.000000e+00 : f32
    %290 = vector.broadcast %cst_105 : f32 to vector<2x128xf32>
    %291 = arith.addf %290, %289 : vector<2x128xf32>
    %292 = arith.divf %290, %291 : vector<2x128xf32>
    %293 = arith.mulf %284, %257 : vector<2x128xf32>
    %294 = arith.mulf %278, %286 : vector<2x128xf32>
    %295 = arith.addf %293, %294 : vector<2x128xf32>
    %296 = math.tanh %295 : vector<2x128xf32>
    %297 = arith.mulf %292, %296 : vector<2x128xf32>
    %cst_106 = arith.constant dense<0.000000e+00> : vector<2x128xf32>
    %298 = tpu.matmul %297, %149, %cst_106 {dimension_numbers = #tpu.dot_dimension_numbers<[1], [0], [0], [1], [0, 0, 1, 1], [], []>} : vector<2x128xf32>, vector<128x128xf32>, vector<2x128xf32> -> vector<2x128xf32>
    %299 = vector.broadcast %150 : vector<1x128xf32> to vector<2x128xf32>
    %300 = arith.addf %298, %299 : vector<2x128xf32>
    %c3_107 = arith.constant 3 : index
    %c0_108 = arith.constant 0 : index
    %c0_109 = arith.constant 0 : index
    %301 = vector.load %arg14[%c3_107, %c0_108, %c0_109] : memref<4x2x128xf32, #tpu.memory_space<vmem>>, vector<1x2x128xf32>
    %302 = vector.shape_cast %301 : vector<1x2x128xf32> to vector<2x128xf32>
    %303 = vector.shape_cast %300 : vector<2x128xf32> to vector<1x2x128xf32>
    tpu.vector_store %arg14[%c3_107, %c0_108, %c0_109], %303 {strides = array<i32>} : memref<4x2x128xf32, #tpu.memory_space<vmem>>, vector<1x2x128xf32>,
    return
  }
}

</mosaic_0001>

<bundles_post_ra>
// kernel: model_forward.1
= control target key start
LH: loop header
LB: loop body
LE: loop exit
PB: predicated region body
PF: predicated region fallthrough
CT: control target
= control target key end

     0   :  { %19 = vsyncpa [#allocation3], 0  ;;  %s5644_s0 = inlined_call_operand.vmem [shape: f32[2,8,128], index: 0, kind: input, shape index: {}]   ;;  %s5645_s1 = inlined_call_operand.vmem [shape: f32[16,16], index: 1, kind: input, shape index: {}]   ;;  %s5646_s2 = inlined_call_operand.vmem [shape: f32[4,2,128], index: 2, kind: input, shape index: {}]   ;;  %s5647_s3 = inlined_call_operand.hbm [shape: f32[128,128], index: 3, kind: input, shape index: {}]   ;;  %s5648_s4 = inlined_call_operand.vmem [shape: f32[1,128], index: 4, kind: input, shape index: {}]   ;;  %s5649_s5 = inlined_call_operand.vmem [shape: f32[2,128,128], index: 5, kind: input, shape index: {}]   ;;  %s5650_s6 = inlined_call_operand.vmem [shape: f32[2,1,128], index: 6, kind: input, shape index: {}]   ;;  %s5651_s7 = inlined_call_operand.vmem [shape: f32[3,128], index: 7, kind: input, shape index: {}]   ;;  %s5652_s8 = inlined_call_operand.hbm [shape: f32[3,128], index: 8, kind: input, shape index: {}]   ;;  %s5653_s9 = inlined_call_operand.hbm [shape: f32[128,512], index: 9, kind: input, shape index: {}]   ;;  %s5654_s10 = inlined_call_operand.hbm [shape: f32[128,512], index: 10, kind: input, shape index: {}]   ;;  %s5655_s11 = inlined_call_operand.hbm [shape: f32[1,512], index: 11, kind: input, shape index: {}]   ;;  %s5656_s12 = inlined_call_operand.hbm [shape: f32[128,128], index: 12, kind: input, shape index: {}]   ;;  %s5657_s13 = inlined_call_operand.hbm [shape: f32[1,128], index: 13, kind: input, shape index: {}]   ;;  %s5658_s14 = inlined_call_operand.vmem [shape: f32[4,2,128], index: 14, kind: output, shape index: {}]  }
   0x1   :  { %20 = vsyncpa [#allocation5], 0 }
   0x2   :  { %21 = vsyncpa [#allocation8], 0 }
   0x3   :  { %22 = vsyncpa [#allocation11], 0  ;;  %s4619_s29 = smov [#allocation4]   ;;  %s4457_s17 = scalar_lea.hbm %s5652_s8, 64 }
   0x4   :  { %s55_s30 = sshll.u32 %s4619_s29, 4  ;;  %p4458_p0 = scmp.ne.s32.totalorder %s5652_s8, %s4457_s17  ;;  %s56_s30 = int_to_ptr.vmem [resolvable:$true] %s55_s30 }
   0x5   :  { %p4461_p1 = scmp.lt.u32.totalorder %s4457_s17, %s5652_s8 }
   0x7   :  { %p4463_p2 = pnand %p4461_p1, %p4458_p0 }
   0x9   :  { %4466 = shalt.err (!%p4463_p2)
}
   0xa   :  { %s4467_s22 = scalar_lea.vmem %s56_s30, 64  ;;  %p4472_p4 = scmp.lt.s32.totalorder %s56_s30, %s56_s30 }
   0xb   :  { %p4468_p3 = scmp.ne.s32.totalorder %s56_s30, %s4467_s22  ;;  %p4473_p5 = scmp.lt.s32.totalorder %s4467_s22, %s4467_s22 }
   0xd   :  { %p4474_p6 = por %p4473_p5, %p4472_p4 }
   0xf   :  { %p4475_p7 = pnand %p4474_p6, %p4468_p3 }
  0x11   :  { %4478 = shalt.err (!%p4475_p7)
}
  0x12   :  { %58 = dma.hbm_to_vmem [thread:$0]  %s5652_s8, 64, %s56_s30, [#allocation5]  }
  0x13   :  { %s4620_s25 = smov [#allocation7]   ;;  %s4479_s29 = scalar_lea.hbm %s5654_s10, 8192 }
  0x14   :  { %s76_s26 = sshll.u32 %s4620_s25, 4  ;;  %p4480_p8 = scmp.ne.s32.totalorder %s5654_s10, %s4479_s29  ;;  %s77_s26 = int_to_ptr.vmem [resolvable:$true] %s76_s26 }
  0x15   :  { %p4483_p9 = scmp.lt.u32.totalorder %s4479_s29, %s5654_s10 }
  0x17   :  { %p4485_p10 = pnand %p4483_p9, %p4480_p8 }
  0x19   :  { %4488 = shalt.err (!%p4485_p10)
}
  0x1a   :  { %s4489_s19 = scalar_lea.vmem %s77_s26, 8192  ;;  %p4494_p12 = scmp.lt.s32.totalorder %s77_s26, %s77_s26 }
  0x1b   :  { %p4490_p11 = scmp.ne.s32.totalorder %s77_s26, %s4489_s19  ;;  %p4495_p13 = scmp.lt.s32.totalorder %s4489_s19, %s4489_s19 }
  0x1d   :  { %p4496_p0 = por %p4495_p13, %p4494_p12 }
  0x1f   :  { %p4497_p1 = pnand %p4496_p0, %p4490_p11 }
  0x21   :  { %4500 = shalt.err (!%p4497_p1)
}
  0x22   :  { %s4621_s8 = smov 512   ;;  %s4622_s30 = smov 32  }
  0x23   :  { %82 = dma.hbm_to_vmem [thread:$0]  %s5654_s10, 8192, %s77_s26, [#allocation8], %s4621_s8, %s4621_s8, %s4622_s30  }
  0x24   :  { %s4623_s22 = smov [#allocation10]   ;;  %s4624_s24 = smov [#allocation2]  }
  0x25   :  { %s98_s23 = sshll.u32 %s4623_s22, 4  ;;  %s34_s25 = sshll.u32 %s4624_s24, 4  ;;  %s99_s23 = int_to_ptr.vmem [resolvable:$true] %s98_s23  ;;  %s4736_s25 = int_to_ptr.vmem [resolvable:$true] %s34_s25 }
  0x26   :  { %s4501_s29 = scalar_lea.hbm %s5656_s12, 2048 }
  0x27   :  { %p4502_p2 = scmp.ne.s32.totalorder %s5656_s12, %s4501_s29  ;;  %p4505_p3 = scmp.lt.u32.totalorder %s4501_s29, %s5656_s12 }
  0x29   :  { %p4507_p4 = pnand %p4505_p3, %p4502_p2 }
  0x2b   :  { %4510 = shalt.err (!%p4507_p4)
}
  0x2c   :  { %s4511_s10 = scalar_lea.vmem %s99_s23, 2048  ;;  %p4516_p6 = scmp.lt.s32.totalorder %s99_s23, %s99_s23 }
  0x2d   :  { %p4512_p5 = scmp.ne.s32.totalorder %s99_s23, %s4511_s10  ;;  %p4517_p7 = scmp.lt.s32.totalorder %s4511_s10, %s4511_s10 }
  0x2f   :  { %p4518_p8 = por %p4517_p7, %p4516_p6 }
  0x31   :  { %p4519_p9 = pnand %p4518_p8, %p4512_p5 }
  0x33   :  { %4522 = shalt.err (!%p4519_p9)
}
  0x34   :  { %s4625_s26 = smov 128   ;;  %s4626_s19 = smov 8  }
  0x35   :  { %104 = dma.hbm_to_vmem [thread:$0]  %s5656_s12, 2048, %s99_s23, [#allocation11], %s4625_s26, %s4625_s26, %s4626_s19  }
  0x36   :  { %s4523_s27 = scalar_lea.hbm %s5647_s3, 2048 }
  0x37   :  { %p4524_p10 = scmp.ne.s32.totalorder %s5647_s3, %s4523_s27  ;;  %p4527_p11 = scmp.lt.u32.totalorder %s4523_s27, %s5647_s3 }
  0x39   :  { %p4529_p12 = pnand %p4527_p11, %p4524_p10 }
  0x3b   :  { %4532 = shalt.err (!%p4529_p12)
}
  0x3c   :  { %s4533_s17 = scalar_lea.vmem %s4736_s25, 2048  ;;  %p4538_p0 = scmp.lt.s32.totalorder %s4736_s25, %s4736_s25 }
  0x3d   :  { %p4534_p13 = scmp.ne.s32.totalorder %s4736_s25, %s4533_s17  ;;  %p4539_p1 = scmp.lt.s32.totalorder %s4533_s17, %s4533_s17 }
  0x3f   :  { %p4540_p2 = por %p4539_p1, %p4538_p0 }
  0x41   :  { %p4541_p3 = pnand %p4540_p2, %p4534_p13 }
  0x43   :  { %4544 = shalt.err (!%p4541_p3)
}
  0x44   :  { %40 = dma.hbm_to_vmem [thread:$0]  %s5647_s3, 2048, %s4736_s25, [#allocation3], %s4625_s26, %s4625_s26, %s4626_s19  }
  0x45   :  { %s4627_s18 = smov [#allocation6]   ;;  %s4628_s20 = smov [#allocation9]  }
  0x46   :  { %s64_s10 = sshll.u32 %s4627_s18, 4  ;;  %s89_s21 = sshll.u32 %s4628_s20, 4  ;;  %s65_s10 = int_to_ptr.vmem [resolvable:$true] %s64_s10  ;;  %s90_s21 = int_to_ptr.vmem [resolvable:$true] %s89_s21 }
  0x47   :  { %s4545_s27 = scalar_lea.hbm %s5653_s9, 8192 }
  0x48   :  { %p4546_p4 = scmp.ne.s32.totalorder %s5653_s9, %s4545_s27  ;;  %p4549_p5 = scmp.lt.u32.totalorder %s4545_s27, %s5653_s9 }
  0x4a   :  { %p4551_p6 = pnand %p4549_p5, %p4546_p4 }
  0x4c   :  { %4554 = shalt.err (!%p4551_p6)
}
  0x4d   :  { %s4555_s3 = scalar_lea.vmem %s65_s10, 8192  ;;  %p4560_p8 = scmp.lt.s32.totalorder %s65_s10, %s65_s10 }
  0x4e   :  { %p4556_p7 = scmp.ne.s32.totalorder %s65_s10, %s4555_s3  ;;  %p4561_p9 = scmp.lt.s32.totalorder %s4555_s3, %s4555_s3 }
  0x50   :  { %p4562_p10 = por %p4561_p9, %p4560_p8 }
  0x52   :  { %p4563_p11 = pnand %p4562_p10, %p4556_p7 }
  0x54   :  { %4566 = shalt.err (!%p4563_p11)
}
  0x55   :  { %70 = dma.hbm_to_vmem [thread:$0]  %s5653_s9, 8192, %s65_s10, [#allocation5], %s4621_s8, %s4621_s8, %s4622_s30  }
  0x56   :  { %s4567_s12 = scalar_lea.hbm %s5655_s11, 64 }
  0x57   :  { %p4568_p12 = scmp.ne.s32.totalorder %s5655_s11, %s4567_s12  ;;  %p4571_p13 = scmp.lt.u32.totalorder %s4567_s12, %s5655_s11 }
  0x59   :  { %p4573_p0 = pnand %p4571_p13, %p4568_p12 }
  0x5b   :  { %4576 = shalt.err (!%p4573_p0)
}
  0x5c   :  { %s4577_s24 = scalar_lea.vmem %s90_s21, 64  ;;  %p4582_p2 = scmp.lt.s32.totalorder %s90_s21, %s90_s21 }
  0x5d   :  { %p4578_p1 = scmp.ne.s32.totalorder %s90_s21, %s4577_s24  ;;  %p4583_p3 = scmp.lt.s32.totalorder %s4577_s24, %s4577_s24 }
  0x5f   :  { %p4584_p4 = por %p4583_p3, %p4582_p2 }
  0x61   :  { %p4585_p5 = pnand %p4584_p4, %p4578_p1 }
  0x63   :  { %4588 = shalt.err (!%p4585_p5)
}
  0x64   :  { %92 = dma.hbm_to_vmem [thread:$0]  %s5655_s11, 64, %s90_s21, [#allocation8]  }
  0x65   :  { %s4629_s30 = smov [#allocation12]   ;;  %s4589_s29 = scalar_lea.hbm %s5657_s13, 16 }
  0x66   :  { %s111_s10 = sshll.u32 %s4629_s30, 4  ;;  %p4590_p6 = scmp.ne.s32.totalorder %s5657_s13, %s4589_s29  ;;  %s112_s10 = int_to_ptr.vmem [resolvable:$true] %s111_s10 }
  0x67   :  { %p4593_p7 = scmp.lt.u32.totalorder %s4589_s29, %s5657_s13 }
  0x69   :  { %p4595_p8 = pnand %p4593_p7, %p4590_p6 }
  0x6b   :  { %4598 = shalt.err (!%p4595_p8)
}
  0x6c   :  { %s4599_s26 = scalar_lea.vmem %s112_s10, 16  ;;  %s4603_s11 = scalar_lea.vmem %s112_s10, 32 }
  0x6d   :  { %p4600_p9 = scmp.ne.s32.totalorder %s112_s10, %s4599_s26  ;;  %p4604_p10 = scmp.lt.s32.totalorder %s112_s10, %s112_s10 }
  0x6e   :  { %p4605_p11 = scmp.lt.s32.totalorder %s4603_s11, %s4599_s26 }
  0x70   :  { %p4606_p12 = por %p4605_p11, %p4604_p10 }
  0x72   :  { %p4607_p13 = pnand %p4606_p12, %p4600_p9 }
  0x74   :  { %4610 = shalt.err (!%p4607_p13)
}
  0x75   :  { %114 = dma.hbm_to_vmem [thread:$0]  %s5657_s13, 16, %s112_s10, [#allocation11]  }
  0x76   :  { %4611 = dma.done.wait [#allocation3], 2048  }
  0x77   :  { %4612 = vsyncadd [#allocation3], 4294965248 }
  0x78   :  { %4613 = dma.done.wait [#allocation5], 8256  }
  0x79   :  { %4614 = vsyncadd [#allocation5], 4294959040 }
  0x7a   :  { %4615 = dma.done.wait [#allocation8], 8256  }
  0x7b   :  { %4616 = vsyncadd [#allocation8], 4294959040 }
  0x7c   :  { %4617 = dma.done.wait [#allocation11], 2064  }
  0x7d   :  { %4618 = vsyncadd [#allocation11], 4294965232  ;;  %v145_v0 = vld [vmem:[#allocation2] sm:$0xff]  ;;  %v146_v1 = vld [vmem:[#allocation2 + $0x8] sm:$0xff]  ;;  %v5659_v26 = vmov 0.0   ;;  %v136_v27 = vlaneseq  ;;  %vm265_vm0 = vcmask 1041409  }
  0x7e   :  { %v147_v2 = vld [vmem:[#allocation2 + $0x10] sm:$0xff]  ;;  %v3616_v3 = vpack.c.bf16 %v146_v1, %v145_v0  ;;  %v148_v4 = vld [vmem:[#allocation2 + $0x18] sm:$0xff]  ;;  %v149_v6 = vld [vmem:[#allocation2 + $0x20] sm:$0xff]  ;;  %vm268_vm1 = vcmask 58368   ;;  %v4631_v49 = vmov 0   ;;  %vm4632_vm2 = vmmov 0  }
  0x7f   :  { %v3620_v5 = vpack.c.bf16 %v148_v4, %v147_v2  ;;  %v150_v7 = vld [vmem:[#allocation2 + $0x28] sm:$0xff]  ;;  %v143_v9 = vld [vmem:[%s5644_s0] sm:$0xff]  ;;  %v151_v10 = vld [vmem:[#allocation2 + $0x30] sm:$0xff]  ;;  %v4813_v28 = vshrl.u32 %v136_v27, 7  ;;  %v4836_v41 = vand.u32 127, %v136_v27  ;;  %4360 = vset.pattern.permute.xlu0 %v4631_v49  ;;  %4359 = vset.pattern.permute.xlu1 %v4631_v49  ;;  %vm333_vm3 = vcmask 64512  }
  0x80   :  { %3617 = vmatprep.subr.bf16.mxu0 %v3616_v3  ;;  %v3624_v8 = vpack.c.bf16 %v150_v7, %v149_v6  ;;  %v152_v11 = vld [vmem:[#allocation2 + $0x38] sm:$0xff]  ;;  %3359 = vmatprep.mubr.f32.mxu0 %v143_v9  ;;  %v153_v13 = vld [vmem:[#allocation2 + $0x40] sm:$0xff]  ;;  %v154_v14 = vld [vmem:[#allocation2 + $0x48] sm:$0xff]  ;;  %vm499_vm4 = vcmask 130048  }
  0x81   :  { %3619 = vmatpush3.bf16.msra.mxu0 %v3616_v3  ;;  %v3628_v12 = vpack.c.bf16 %v152_v11, %v151_v10  ;;  %v3632_v15 = vpack.c.bf16 %v154_v14, %v153_v13  ;;  %v155_v16 = vld [vmem:[#allocation2 + $0x50] sm:$0xff]  ;;  %v156_v17 = vld [vmem:[#allocation2 + $0x58] sm:$0xff]  ;;  %v157_v19 = vld [vmem:[#allocation2 + $0x60] sm:$0xff]  ;;  %v4816_v29 = vsub.s32 0, %v4813_v28  ;;  %v4840_v43 = vsub.s32 %v4836_v41, %v4813_v28 }
  0x82   :  { %3621 = vmatprep.subr.bf16.mxu0 %v3620_v5  ;;  %v3636_v18 = vpack.c.bf16 %v156_v17, %v155_v16  ;;  %v158_v20 = vld [vmem:[#allocation2 + $0x68] sm:$0xff]  ;;  %v159_v22 = vld [vmem:[#allocation2 + $0x70] sm:$0xff]  ;;  %v160_v23 = vld [vmem:[#allocation2 + $0x78] sm:$0xff]  ;;  %v4847_v50 = vsub.s32 1, %v4813_v28  ;;  %vm138_vm5 = vcmp.lt.s32.totalorder %v4836_v41, 32 }
  0x83   :  { %v3640_v21 = vpack.c.bf16 %v158_v20, %v157_v19  ;;  %v3644_v24 = vpack.c.bf16 %v160_v23, %v159_v22  ;;  %v144_v25 = vld [vmem:[%s5644_s0 + $0x8] sm:$0xff]  ;;  %v3136_v30 = vld [vmem:[%s5648_s4] ss:$0 sm:$0xff]  ;;  %v583_v11 = vld [vmem:[%s5649_s5 + $0x10] sm:$0xff] }
  0x84   :  { %v4824_v31 = vld [vmem:[%s5651_s7] sm:$0x7]  ;;  %v582_v10 = vld [vmem:[%s5649_s5 + $0x8] sm:$0xff]  ;;  %v584_v13 = vld [vmem:[%s5649_s5 + $0x18] sm:$0xff] }
  0x85   :  { %3623 = vmatpush3.bf16.msra.mxu0 %v3620_v5  ;;  %v248_v36 = vrot.slane %v4824_v31, %v4816_v29  ;;  %v581_v9 = vld [vmem:[%s5649_s5] sm:$0xff]  ;;  %v3656_v14 = vpack.c.bf16 %v584_v13, %v583_v11  ;;  %v586_v16 = vld [vmem:[%s5649_s5 + $0x28] sm:$0xff]  ;;  %v588_v19 = vld [vmem:[%s5649_s5 + $0x38] sm:$0xff] }
  0x86   :  { %3625 = vmatprep.subr.bf16.mxu0 %v3624_v8  ;;  %v590_v22 = vld [vmem:[%s5649_s5 + $0x48] sm:$0xff] }
  0x89   :  { %3627 = vmatpush3.bf16.msra.mxu0 %v3624_v8 }
  0x8a   :  { %3629 = vmatprep.subr.bf16.mxu0 %v3628_v12 }
  0x8d   :  { %3631 = vmatpush3.bf16.msra.mxu0 %v3628_v12  ;;  %v3652_v12 = vpack.c.bf16 %v582_v10, %v581_v9 }
  0x8e   :  { %3633 = vmatprep.subr.bf16.mxu0 %v3632_v15 }
  0x8f   :  { %3653 = vmatprep.subr.bf16.mxu1 %v3652_v12 }
  0x90   :  { %3655 = vmatpush3.bf16.msra.mxu1 %v3652_v12 }
  0x91   :  { %3635 = vmatpush3.bf16.msra.mxu0 %v3632_v15  ;;  %v585_v15 = vld [vmem:[%s5649_s5 + $0x20] sm:$0xff]  ;;  %3657 = vmatprep.subr.bf16.mxu1 %v3656_v14 }
  0x92   :  { %3637 = vmatprep.subr.bf16.mxu0 %v3636_v18  ;;  %v3660_v17 = vpack.c.bf16 %v586_v16, %v585_v15 }
  0x94   :  { %3659 = vmatpush3.bf16.msra.mxu1 %v3656_v14 }
  0x95   :  { %3639 = vmatpush3.bf16.msra.mxu0 %v3636_v18  ;;  %v587_v18 = vld [vmem:[%s5649_s5 + $0x30] sm:$0xff]  ;;  %3661 = vmatprep.subr.bf16.mxu1 %v3660_v17 }
  0x96   :  { %3641 = vmatprep.subr.bf16.mxu0 %v3640_v21  ;;  %v3664_v20 = vpack.c.bf16 %v588_v19, %v587_v18  ;;  %v712_v19 = vrot.slane %v4824_v31, %v4847_v50 }
  0x98   :  { %3663 = vmatpush3.bf16.msra.mxu1 %v3660_v17 }
  0x99   :  { %3643 = vmatpush3.bf16.msra.mxu0 %v3640_v21  ;;  %v589_v21 = vld [vmem:[%s5649_s5 + $0x40] sm:$0xff]  ;;  %3665 = vmatprep.subr.bf16.mxu1 %v3664_v20 }
  0x9a   :  { %3645 = vmatprep.subr.bf16.mxu0 %v3644_v24  ;;  %v3668_v23 = vpack.c.bf16 %v590_v22, %v589_v21 }
  0x9c   :  { %3667 = vmatpush3.bf16.msra.mxu1 %v3664_v20 }
  0x9d   :  { %3647 = vmatpush3.bf16.msra.mxu0 %v3644_v24  ;;  %v591_v24 = vld [vmem:[%s5649_s5 + $0x50] sm:$0xff]  ;;  %3669 = vmatprep.subr.bf16.mxu1 %v3668_v23 }
  0x9e   :  { %3362 = vmatprep.subr.mxu0 %v5659_v26 }
  0xa0   :  { %3360 = vmatmul.mubr.f32.vlgmr.msra.gmra.mrb[0].mxu0 %v144_v25  ;;  %v592_v25 = vld [vmem:[%s5649_s5 + $0x58] sm:$0xff]  ;;  %3671 = vmatpush3.bf16.msra.mxu1 %v3668_v23 }
  0xa1   :  { %3364 = vmatprep.mubr.msk.f32.mxu0 %vm4632_vm2, %v5659_v26  ;;  %v3672_v27 = vpack.c.bf16 %v592_v25, %v591_v24 }
  0xa3   :  { %3673 = vmatprep.subr.bf16.mxu1 %v3672_v27 }
  0xa4   :  { %3675 = vmatpush3.bf16.msra.mxu1 %v3672_v27 }
 0x173   :  { %v3361_v32 = vpop.f32.mrb[0].mxu0 }
 0x174   :  { %v234_v33 = vpop.f32.mrb[1].mxu0  ;;  %v240_v34 = vadd.f32 %v3361_v32, %v3136_v30 }
 0x175   :  { %v235_v35 = vadd.f32 %v3136_v30, %v234_v33 }
 0x176   :  { %v4830_v38 = vmax.f32 %v240_v34, 0.0 }
 0x177   :  { %v4828_v37 = vmax.f32 %v235_v35, 0.0 }
 0x178   :  { %v250_v40 = vmul.f32 %v248_v36, %v4830_v38 }
 0x179   :  { %3363 = vmatpush3.msra.mxu0 %v4828_v37  ;;  %v249_v39 = vmul.f32 %v248_v36, %v4828_v37  ;;  %v3648_v33 = vpack.c.bf16 %v4830_v38, %v4828_v37  ;;  %v4906_v36 = vld [vmem:[%s5645_s1] sm:$0xff] }
 0x17a   :  { %3367 = vmatprep.subr.mxu0 %v5659_v26 }
 0x17b   :  { %251 = vadd.xlane.f32.xlu0 %v249_v39  ;;  %v4914_v39 = vld [vmem:[%s5645_s1 + $0x8] sm:$0xff] }
 0x17f   :  { %253 = vadd.xlane.f32.xlu0 %v250_v40  ;;  %v593_v40 = vld [vmem:[%s5649_s5 + $0x60] sm:$0xff] }
 0x208   :  { %v252_v42 = vpop.xlane.xlu0 %251 }
 0x209   :  { %v260_v45 = vrot.slane %v252_v42, %v4840_v43 }
 0x20c   :  { %v254_v44 = vpop.xlane.xlu0 %253 }
 0x20d   :  { %v264_v46 = vrot.slane %v254_v44, %v4840_v43 }
 0x20f   :  { %v266_v47 = vsel %vm265_vm0, %v264_v46, %v260_v45  ;;  %v595_v45 = vld [vmem:[%s5649_s5 + $0x70] sm:$0xff]  ;;  %v596_v46 = vld [vmem:[%s5649_s5 + $0x78] sm:$0xff] }
 0x210   :  { %v269_v48 = vsel %vm268_vm1, %v266_v47, -inf  ;;  %v3680_v47 = vpack.c.bf16 %v596_v46, %v595_v45 }
 0x211   :  { %270 = vmax.xlane.f32.xlu1 %v269_v48 }
 0x29e   :  { %v271_v51 = vpop.xlane.xlu1 %270 }
 0x29f   :  { %v276_v52 = vrot.slane %v271_v51, %v4816_v29  ;;  %v280_v53 = vrot.slane %v271_v51, %v4847_v50 }
 0x2a1   :  { %v283_v54 = vsub.f32 %v252_v42, %v276_v52  ;;  %v284_v55 = vsub.f32 %v254_v44, %v280_v53  ;;  %v594_v42 = vld [vmem:[%s5649_s5 + $0x68] sm:$0xff] }
 0x2a2   :  { %v3676_v44 = vpack.c.bf16 %v594_v42, %v593_v40 }
 0x2a3   :  { %v285_v56 = vmul.f32 1.442695, %v283_v54  ;;  %v287_v57 = vmul.f32 1.442695, %v284_v55 }
 0x2a4   :  { %3677 = vmatprep.subr.bf16.mxu1 %v3676_v44 }
 0x2a5   :  { %4361 = vpow2.f32 %v285_v56  ;;  %3679 = vmatpush3.bf16.msra.mxu1 %v3676_v44 }
 0x2a6   :  { %4363 = vpow2.f32 %v287_v57  ;;  %3681 = vmatprep.subr.bf16.mxu1 %v3680_v47  ;;  %v3141_v57 = vld [vmem:[%s5650_s6] ss:$0 sm:$0xff] }
 0x2a9   :  { %3683 = vmatpush3.bf16.msra.mxu1 %v3680_v47 }
 0x2af   :  { %v4362_v58 = vpop.eup %4361 }
 0x2b0   :  { %v4364_v59 = vpop.eup %4363  ;;  %292 = vperm.xlu1 %4359, %v4362_v58  }
 0x2b1   :  { %295 = vperm.xlu0 %4360, %v4364_v59  }
 0x32f   :  { %v293_v60 = vpop.permute.xlu1 %292 }
 0x330   :  { %v296_v61 = vpop.permute.xlu0 %295  ;;  %v300_v62 = vrot.slane %v293_v60, %v4840_v43 }
 0x331   :  { %v304_v63 = vrot.slane %v296_v61, %v4840_v43 }
 0x333   :  { %v305_v0 = vsel %vm265_vm0, %v304_v63, %v300_v62 }
 0x334   :  { %v307_v1 = vsel %vm268_vm1, %v305_v0, 0.0 }
 0x335   :  { %308 = vadd.xlane.f32.xlu1 %v307_v1 }
 0x3c2   :  { %v309_v2 = vpop.xlane.xlu1 %308 }
 0x3c3   :  { %v314_v3 = vrot.slane %v309_v2, %v4816_v29  ;;  %v318_v4 = vrot.slane %v309_v2, %v4847_v50 }
 0x3c5   :  { %4365 = vrcp.f32 %v314_v3 }
 0x3c6   :  { %4367 = vrcp.f32 %v318_v4 }
 0x3cf   :  { %v4366_v5 = vpop.eup %4365 }
 0x3d0   :  { %v322_v6 = vmul.f32 %v4366_v5, %v4362_v58  ;;  %v4368_v7 = vpop.eup %4367 }
 0x3d1   :  { %v324_v8 = vmul.f32 %v4368_v7, %v4364_v59  ;;  %v4941_v59 = vsel %vm138_vm5, 1.0, %v5659_v26 }
 0x3d2   :  { %327 = vperm.xlu0 %4360, %v322_v6  }
 0x3d6   :  { %408 = vperm.xlu0 %4360, %v324_v8  }
 0x451   :  { %v328_v30 = vpop.permute.xlu0 %327 }
 0x452   :  { %v332_v32 = vrot.slane %v328_v30, %v4840_v43 }
 0x454   :  { %3365 = vmatmul.mubr.msk.f32.vlgmr.msra.gmra.mrb[2].mxu0 %vm333_vm3, %v332_v32 }
 0x455   :  { %3368 = vmatpush3.msra.mxu0 %v4830_v38  ;;  %v409_v34 = vpop.permute.xlu0 %408  ;;  %3369 = vmatprep.mubr.msk.f32.mxu0 %vm4632_vm2, %v5659_v26 }
 0x456   :  { %3649 = vmatprep.subr.bf16.mxu0 %v3648_v33  ;;  %v413_v35 = vrot.slane %v409_v34, %v4840_v43 }
 0x458   :  { %3370 = vmatmul.mubr.msk.f32.vlgmr.msra.gmra.mrb[4].mxu0 %vm333_vm3, %v413_v35 }
 0x459   :  { %3651 = vmatpush3.bf16.msra.mxu0 %v3648_v33  ;;  %3376 = vmatprep.mubr.msk.f32.mxu0 %vm499_vm4, %v4906_v36 }
 0x45a   :  { %3414 = vmatprep.subr.mxu0 %v5659_v26 }
 0x45c   :  { %3377 = vmatmul.mubr.msk.f32.vlgmr.msra.gmra.mrb[6].mxu0 %vm499_vm4, %v4914_v39 }
 0x45d   :  { %3416 = vmatprep.mubr.msk.f32.mxu0 %vm4632_vm2, %v5659_v26 }
 0x527   :  { %v402_v48 = vpop.f32.mrb[2].mxu0 }
 0x528   :  { %v3366_v49 = vpop.f32.mrb[3].mxu0 }
 0x52b   :  { %v482_v51 = vpop.f32.mrb[4].mxu0 }
 0x52c   :  { %v492_v52 = vrot.slane %v482_v51, 7  ;;  %v3371_v53 = vpop.f32.mrb[5].mxu0 }
 0x52e   :  { %v4934_v54 = vsel %vm265_vm0, %v492_v52, %v402_v48 }
 0x52f   :  { %v3378_v55 = vpop.f32.mrb[6].mxu0 }
 0x530   :  { %v572_v56 = vpop.f32.mrb[7].mxu0 }
 0x531   :  { %3411 = vmatprep.mubr.f32.mxu1 %v572_v56 }
 0x532   :  { %3412 = vmatmul.mubr.f32.vlgmr.msra.gmra.mrb[0].mxu1 %v3378_v55 }
 0x605   :  { %v3413_v58 = vpop.f32.mrb[0].mxu1 }
 0x606   :  { %v676_v60 = vadd.f32 %v3413_v58, %v3141_v57  ;;  %v670_v61 = vpop.f32.mrb[1].mxu1 }
 0x607   :  { %v671_v62 = vadd.f32 %v3141_v57, %v670_v61 }
 0x608   :  { %v680_v63 = vmul.f32 %v4941_v59, %v676_v60 }
 0x609   :  { %v679_v0 = vmul.f32 %v4941_v59, %v671_v62 }
 0x60a   :  { %683 = vadd.xlane.f32.xlu0 %v680_v63 }
 0x60b   :  { %681 = vadd.xlane.f32.xlu1 %v679_v0 }
 0x697   :  { %v684_v1 = vpop.xlane.xlu0 %683 }
 0x698   :  { %v686_v2 = vmul.f32 0.03125, %v684_v1  ;;  %v682_v41 = vpop.xlane.xlu1 %681 }
 0x699   :  { %v685_v3 = vmul.f32 0.03125, %v682_v41  ;;  %v3147_v41 = vld [vmem:[%s5649_s5 + $0x88] sm:$0xff] }
 0x69a   :  { %v688_v4 = vsub.f32 %v676_v60, %v686_v2  ;;  %v3146_v2 = vld [vmem:[%s5649_s5 + $0x80] sm:$0xff] }
 0x69b   :  { %v687_v5 = vsub.f32 %v671_v62, %v685_v3  ;;  %v3148_v3 = vld [vmem:[%s5649_s5 + $0x90] sm:$0xff] }
 0x69c   :  { %v690_v8 = vmul.f32 %v4941_v59, %v688_v4  ;;  %v3688_v4 = vpack.c.bf16 %v3147_v41, %v3146_v2 }
 0x69d   :  { %v689_v6 = vmul.f32 %v4941_v59, %v687_v5  ;;  %v3149_v5 = vld [vmem:[%s5649_s5 + $0x98] sm:$0xff] }
 0x69e   :  { %v692_v9 = vmul.f32 %v690_v8, %v690_v8  ;;  %3689 = vmatprep.subr.bf16.mxu1 %v3688_v4 }
 0x69f   :  { %v691_v7 = vmul.f32 %v689_v6, %v689_v6  ;;  %3691 = vmatpush3.bf16.msra.mxu1 %v3688_v4 }
 0x6a1   :  { %693 = vadd.xlane.f32.xlu1 %v691_v7  ;;  %v3150_v7 = vld [vmem:[%s5649_s5 + $0xa0] sm:$0xff] }
 0x6a5   :  { %695 = vadd.xlane.f32.xlu1 %v692_v9 }
 0x72e   :  { %v694_v10 = vpop.xlane.xlu1 %693 }
 0x72f   :  { %v697_v11 = vmul.f32 0.03125, %v694_v10  ;;  %v3152_v10 = vld [vmem:[%s5649_s5 + $0xb0] sm:$0xff] }
 0x731   :  { %v699_v12 = vadd.f32 1e-05, %v697_v11  ;;  %v3153_v11 = vld [vmem:[%s5649_s5 + $0xb8] sm:$0xff] }
 0x732   :  { %v696_v13 = vpop.xlane.xlu1 %695 }
 0x733   :  { %4369 = vrsqrt.f32 %v699_v12  ;;  %v698_v14 = vmul.f32 0.03125, %v696_v13  ;;  %v3700_v12 = vpack.c.bf16 %v3153_v11, %v3152_v10  ;;  %v3154_v13 = vld [vmem:[%s5649_s5 + $0xc0] sm:$0xff] }
 0x735   :  { %v700_v15 = vadd.f32 1e-05, %v698_v14  ;;  %v3155_v14 = vld [vmem:[%s5649_s5 + $0xc8] sm:$0xff] }
 0x737   :  { %4371 = vrsqrt.f32 %v700_v15  ;;  %v3704_v15 = vpack.c.bf16 %v3155_v14, %v3154_v13 }
 0x73d   :  { %v4370_v16 = vpop.eup %4369 }
 0x73e   :  { %v703_v17 = vmul.f32 %v4370_v16, %v689_v6  ;;  %v3692_v6 = vpack.c.bf16 %v3149_v5, %v3148_v3  ;;  %v3156_v16 = vld [vmem:[%s5649_s5 + $0xd0] sm:$0xff] }
 0x740   :  { %v705_v18 = vmax.f32 %v703_v17, 0.0  ;;  %3693 = vmatprep.subr.bf16.mxu1 %v3692_v6  ;;  %v3157_v17 = vld [vmem:[%s5649_s5 + $0xd8] sm:$0xff] }
 0x741   :  { %v4372_v20 = vpop.eup %4371  ;;  %3695 = vmatpush3.bf16.msra.mxu1 %v3692_v6 }
 0x742   :  { %v4950_v21 = vadd.f32 %v705_v18, %v4828_v37  ;;  %v704_v22 = vmul.f32 %v4372_v20, %v690_v8  ;;  %v3151_v8 = vld [vmem:[%s5649_s5 + $0xa8] sm:$0xff]  ;;  %v3708_v18 = vpack.c.bf16 %v3157_v17, %v3156_v16 }
 0x743   :  { %v3696_v9 = vpack.c.bf16 %v3151_v8, %v3150_v7 }
 0x744   :  { %3415 = vmatpush3.msra.mxu0 %v4950_v21  ;;  %v713_v23 = vmul.f32 %v712_v19, %v4950_v21  ;;  %v706_v24 = vmax.f32 %v704_v22, 0.0 }
 0x745   :  { %3419 = vmatprep.subr.mxu0 %v5659_v26  ;;  %3697 = vmatprep.subr.bf16.mxu1 %v3696_v9 }
 0x746   :  { %715 = vadd.xlane.f32.xlu1 %v713_v23  ;;  %v4956_v25 = vadd.f32 %v706_v24, %v4830_v38  ;;  %3699 = vmatpush3.bf16.msra.mxu1 %v3696_v9 }
 0x747   :  { %3701 = vmatprep.subr.bf16.mxu1 %v3700_v12 }
 0x748   :  { %v714_v27 = vmul.f32 %v712_v19, %v4956_v25  ;;  %v3684_v22 = vpack.c.bf16 %v4956_v25, %v4950_v21 }
 0x74a   :  { %717 = vadd.xlane.f32.xlu1 %v714_v27  ;;  %3703 = vmatpush3.bf16.msra.mxu1 %v3700_v12  ;;  %v3158_v27 = vld [vmem:[%s5649_s5 + $0xe0] sm:$0xff]  ;;  %v5054_v12 = vsub.s32 2, %v4813_v28 }
 0x74b   :  { %3705 = vmatprep.subr.bf16.mxu1 %v3704_v15 }
 0x74e   :  { %3707 = vmatpush3.bf16.msra.mxu1 %v3704_v15 }
 0x74f   :  { %3709 = vmatprep.subr.bf16.mxu1 %v3708_v18 }
 0x752   :  { %3711 = vmatpush3.bf16.msra.mxu1 %v3708_v18 }
 0x7d3   :  { %v716_v30 = vpop.xlane.xlu1 %715 }
 0x7d4   :  { %v724_v37 = vrot.slane %v716_v30, %v4840_v43 }
 0x7d7   :  { %v718_v32 = vpop.xlane.xlu1 %717 }
 0x7d8   :  { %v728_v33 = vrot.slane %v718_v32, %v4840_v43 }
 0x7da   :  { %v729_v34 = vsel %vm265_vm0, %v728_v33, %v724_v37 }
 0x7db   :  { %v731_v35 = vsel %vm268_vm1, %v729_v34, -inf  ;;  %v5035_v34 = vld [vmem:[#allocation4] sm:$0x7] }
 0x7dc   :  { %732 = vmax.xlane.f32.xlu1 %v731_v35 }
 0x869   :  { %v733_v40 = vpop.xlane.xlu1 %732 }
 0x86a   :  { %v738_v42 = vrot.slane %v733_v40, %v4816_v29  ;;  %v742_v38 = vrot.slane %v733_v40, %v4847_v50  ;;  %v489_v40 = vrot.slane %v5035_v34, %v4816_v29 }
 0x86c   :  { %v745_v44 = vsub.f32 %v716_v30, %v738_v42  ;;  %v746_v45 = vsub.f32 %v718_v32, %v742_v38  ;;  %v3159_v30 = vld [vmem:[%s5649_s5 + $0xe8] sm:$0xff]  ;;  %v950_v38 = vrot.slane %v5035_v34, %v4847_v50 }
 0x86d   :  { %v3712_v32 = vpack.c.bf16 %v3159_v30, %v3158_v27 }
 0x86e   :  { %v747_v46 = vmul.f32 1.442695, %v745_v44  ;;  %v749_v47 = vmul.f32 1.442695, %v746_v45 }
 0x86f   :  { %3713 = vmatprep.subr.bf16.mxu1 %v3712_v32 }
 0x870   :  { %4373 = vpow2.f32 %v747_v46  ;;  %3715 = vmatpush3.bf16.msra.mxu1 %v3712_v32 }
 0x871   :  { %4375 = vpow2.f32 %v749_v47  ;;  %v495_v47 = vmul.f32 %v4934_v54, %v489_v40 }
 0x87a   :  { %v4374_v48 = vpop.eup %4373 }
 0x87b   :  { %v4376_v49 = vpop.eup %4375  ;;  %754 = vperm.xlu1 %4359, %v4374_v48  }
 0x87c   :  { %757 = vperm.xlu0 %4360, %v4376_v49  }
 0x8fa   :  { %v755_v51 = vpop.permute.xlu1 %754 }
 0x8fb   :  { %v758_v52 = vpop.permute.xlu0 %757  ;;  %v762_v53 = vrot.slane %v755_v51, %v4840_v43 }
 0x8fc   :  { %v766_v55 = vrot.slane %v758_v52, %v4840_v43 }
 0x8fe   :  { %v767_v56 = vsel %vm265_vm0, %v766_v55, %v762_v53  ;;  %v3163_v53 = vld [vmem:[%s5650_s6 + $0x1] ss:$0 sm:$0xff] }
 0x8ff   :  { %v769_v57 = vsel %vm268_vm1, %v767_v56, 0.0 }
 0x900   :  { %770 = vadd.xlane.f32.xlu1 %v769_v57 }
 0x98d   :  { %v771_v58 = vpop.xlane.xlu1 %770 }
 0x98e   :  { %v776_v60 = vrot.slane %v771_v58, %v4816_v29  ;;  %v780_v61 = vrot.slane %v771_v58, %v4847_v50 }
 0x990   :  { %4377 = vrcp.f32 %v776_v60 }
 0x991   :  { %4379 = vrcp.f32 %v780_v61 }
 0x99a   :  { %v4378_v62 = vpop.eup %4377 }
 0x99b   :  { %v784_v63 = vmul.f32 %v4378_v62, %v4374_v48  ;;  %v4380_v0 = vpop.eup %4379 }
 0x99c   :  { %v786_v1 = vmul.f32 %v4380_v0, %v4376_v49 }
 0x99d   :  { %789 = vperm.xlu0 %4360, %v784_v63  }
 0x9a1   :  { %869 = vperm.xlu0 %4360, %v786_v1  }
 0xa1c   :  { %v790_v19 = vpop.permute.xlu0 %789 }
 0xa1d   :  { %v794_v20 = vrot.slane %v790_v19, %v4840_v43 }
 0xa1f   :  { %3417 = vmatmul.mubr.msk.f32.vlgmr.msra.gmra.mrb[8].mxu0 %vm333_vm3, %v794_v20 }
 0xa20   :  { %3420 = vmatpush3.msra.mxu0 %v4956_v25  ;;  %v870_v23 = vpop.permute.xlu0 %869  ;;  %3421 = vmatprep.mubr.msk.f32.mxu0 %vm4632_vm2, %v5659_v26 }
 0xa21   :  { %3685 = vmatprep.subr.bf16.mxu0 %v3684_v22  ;;  %v874_v24 = vrot.slane %v870_v23, %v4840_v43 }
 0xa23   :  { %3422 = vmatmul.mubr.msk.f32.vlgmr.msra.gmra.mrb[10].mxu0 %vm333_vm3, %v874_v24 }
 0xa24   :  { %3687 = vmatpush3.bf16.msra.mxu0 %v3684_v22  ;;  %3428 = vmatprep.mubr.msk.f32.mxu0 %vm499_vm4, %v4906_v36  ;;  %v3160_v36 = vld [vmem:[%s5649_s5 + $0xf0] sm:$0xff] }
 0xa25   :  { %3466 = vmatprep.subr.mxu0 %v5659_v26 }
 0xa27   :  { %3429 = vmatmul.mubr.msk.f32.vlgmr.msra.gmra.mrb[12].mxu0 %vm499_vm4, %v4914_v39  ;;  %v3161_v39 = vld [vmem:[%s5649_s5 + $0xf8] sm:$0xff] }
 0xa28   :  { %3468 = vmatprep.mubr.msk.f32.mxu0 %vm4632_vm2, %v5659_v26  ;;  %v3716_v37 = vpack.c.bf16 %v3161_v39, %v3160_v36 }
 0xa2a   :  { %3717 = vmatprep.subr.bf16.mxu1 %v3716_v37 }
 0xa2b   :  { %3719 = vmatpush3.bf16.msra.mxu1 %v3716_v37 }
 0xaf2   :  { %v863_v33 = vpop.f32.mrb[8].mxu0 }
 0xaf3   :  { %v3418_v35 = vpop.f32.mrb[9].mxu0 }
 0xaf6   :  { %v943_v42 = vpop.f32.mrb[10].mxu0 }
 0xaf7   :  { %v953_v44 = vrot.slane %v943_v42, 7  ;;  %v3423_v45 = vpop.f32.mrb[11].mxu0 }
 0xaf9   :  { %v954_v46 = vsel %vm265_vm0, %v953_v44, %v863_v33 }
 0xafa   :  { %v956_v48 = vmul.f32 %v954_v46, %v950_v38  ;;  %v3430_v49 = vpop.f32.mrb[12].mxu0 }
 0xafb   :  { %v1024_v51 = vpop.f32.mrb[13].mxu0 }
 0xafc   :  { %v5043_v52 = vadd.f32 %v956_v48, %v495_v47  ;;  %3463 = vmatprep.mubr.f32.mxu1 %v1024_v51 }
 0xafd   :  { %3464 = vmatmul.mubr.f32.vlgmr.msra.gmra.mrb[2].mxu1 %v3430_v49 }
 0xafe   :  { %1694 = vmatprep.mubr.f32.mxu1 %v5659_v26 }
 0xbd0   :  { %v3465_v55 = vpop.f32.mrb[2].mxu1 }
 0xbd1   :  { %v1130_v56 = vadd.f32 %v3465_v55, %v3163_v53  ;;  %v1124_v57 = vpop.f32.mrb[3].mxu1 }
 0xbd2   :  { %v1125_v58 = vadd.f32 %v3163_v53, %v1124_v57 }
 0xbd3   :  { %v1134_v60 = vmul.f32 %v4941_v59, %v1130_v56 }
 0xbd4   :  { %v1133_v54 = vmul.f32 %v4941_v59, %v1125_v58 }
 0xbd5   :  { %1137 = vadd.xlane.f32.xlu1 %v1134_v60 }
 0xbd6   :  { %1135 = vadd.xlane.f32.xlu0 %v1133_v54  ;;  %v1479_v54 = vld [vmem:[#allocation7 + $0x18] sm:$0xff] }
 0xc62   :  { %v1138_v61 = vpop.xlane.xlu1 %1137 }
 0xc63   :  { %v1140_v62 = vmul.f32 0.03125, %v1138_v61  ;;  %v1136_v63 = vpop.xlane.xlu0 %1135  ;;  %v1483_v61 = vld [vmem:[#allocation7 + $0x38] sm:$0xff] }
 0xc64   :  { %v1139_v0 = vmul.f32 0.03125, %v1136_v63  ;;  %v1478_v63 = vld [vmem:[#allocation7 + $0x10] sm:$0xff] }
 0xc65   :  { %v1142_v1 = vsub.f32 %v1130_v56, %v1140_v62  ;;  %v5076_v62 = vpack.c.bf16 %v1483_v61, %v1479_v54  ;;  %v1500_v61 = vld [vmem:[#allocation7 + $0xc0] sm:$0xff] }
 0xc66   :  { %v1141_v2 = vsub.f32 %v1125_v58, %v1139_v0  ;;  %v1482_v0 = vld [vmem:[#allocation7 + $0x30] sm:$0xff] }
 0xc67   :  { %v1144_v4 = vmul.f32 %v4941_v59, %v1142_v1  ;;  %5749 = vst [vmem:[#allocation17_spill] sm:$0xff] %v5076_v62  ;;  %v5078_v1 = vpack.c.bf16 %v1482_v0, %v1478_v63  ;;  %3753 = vmatprep.subr.bf16.mxu1 %v5076_v62  ;;  %v1504_v63 = vld [vmem:[#allocation7 + $0xe0] sm:$0xff]  ;;  %v1509_v0 = vld [vmem:[#allocation7 + $0x108] sm:$0xff] }
 0xc68   :  { %v1143_v41 = vmul.f32 %v4941_v59, %v1141_v2  ;;  %v1166_v59 = vrot.slane %v4824_v31, %v5054_v12  ;;  %v1487_v2 = vld [vmem:[#allocation7 + $0x58] sm:$0xff] }
 0xc69   :  { %v1146_v5 = vmul.f32 %v1144_v4, %v1144_v4  ;;  %3755 = vmatpush1.bf16.msra.mxu1 %v5078_v1 }
 0xc6a   :  { %v1145_v3 = vmul.f32 %v1143_v41, %v1143_v41 }
 0xc6c   :  { %1147 = vadd.xlane.f32.xlu1 %v1145_v3 }
 0xc70   :  { %1149 = vadd.xlane.f32.xlu1 %v1146_v5  ;;  %v1490_v5 = vld [vmem:[#allocation7 + $0x70] sm:$0xff] }
 0xcf9   :  { %v1148_v6 = vpop.xlane.xlu1 %1147 }
 0xcfa   :  { %v1151_v7 = vmul.f32 0.03125, %v1148_v6 }
 0xcfc   :  { %v1153_v8 = vadd.f32 1e-05, %v1151_v7  ;;  %v1495_v7 = vld [vmem:[#allocation7 + $0x98] sm:$0xff] }
 0xcfd   :  { %v1150_v9 = vpop.xlane.xlu1 %1149 }
 0xcfe   :  { %4381 = vrsqrt.f32 %v1153_v8  ;;  %v1152_v10 = vmul.f32 0.03125, %v1150_v9  ;;  %v1499_v8 = vld [vmem:[#allocation7 + $0xb8] sm:$0xff] }
 0xcff   :  { %v5087_v9 = vpack.c.bf16 %v1499_v8, %v1495_v7  ;;  %v1512_v7 = vld [vmem:[#allocation7 + $0x120] sm:$0xff]  ;;  %v1517_v8 = vld [vmem:[#allocation7 + $0x148] sm:$0xff] }
 0xd00   :  { %v1154_v11 = vadd.f32 1e-05, %v1152_v10  ;;  %v1494_v10 = vld [vmem:[#allocation7 + $0x90] sm:$0xff] }
 0xd02   :  { %4383 = vrsqrt.f32 %v1154_v11  ;;  %v1498_v11 = vld [vmem:[#allocation7 + $0xb0] sm:$0xff] }
 0xd08   :  { %v4382_v13 = vpop.eup %4381 }
 0xd09   :  { %v1157_v14 = vmul.f32 %v4382_v13, %v1143_v41  ;;  %v1491_v41 = vld [vmem:[#allocation7 + $0x78] sm:$0xff]  ;;  %v5091_v13 = vpack.c.bf16 %v1498_v11, %v1494_v10  ;;  %v1521_v10 = vld [vmem:[#allocation7 + $0x168] sm:$0xff] }
 0xd0a   :  { %v5081_v3 = vpack.c.bf16 %v1491_v41, %v1487_v2  ;;  %v1513_v2 = vld [vmem:[#allocation7 + $0x128] sm:$0xff]  ;;  %v5137_v41 = vpack.c.bf16 %v1504_v63, %v1500_v61  ;;  %v1534_v61 = vld [vmem:[#allocation7 + $0x1d0] sm:$0xff] }
 0xd0b   :  { %v1159_v15 = vmax.f32 %v1157_v14, 0.0  ;;  %v1503_v14 = vld [vmem:[#allocation7 + $0xd8] sm:$0xff]  ;;  %v1538_v63 = vld [vmem:[#allocation7 + $0x1f0] sm:$0xff] }
 0xd0c   :  { %v4384_v16 = vpop.eup %4383  ;;  %3757 = vmatprep.subr.bf16.mxu1 %v5081_v3  ;;  %5757 = vst [vmem:[#allocation25_spill] sm:$0xff] %v5137_v41 }
 0xd0d   :  { %v1161_v17 = vadd.f32 %v1159_v15, %v4950_v21  ;;  %v1158_v18 = vmul.f32 %v4384_v16, %v1144_v4  ;;  %v1486_v4 = vld [vmem:[#allocation7 + $0x50] sm:$0xff]  ;;  %v1507_v15 = vld [vmem:[#allocation7 + $0xf8] sm:$0xff] }
 0xd0e   :  { %v5085_v6 = vpack.c.bf16 %v1490_v5, %v1486_v4  ;;  %v1502_v16 = vld [vmem:[#allocation7 + $0xd0] sm:$0xff]  ;;  %v5140_v4 = vpack.c.bf16 %v1513_v2, %v1509_v0  ;;  %v1508_v5 = vld [vmem:[#allocation7 + $0x100] sm:$0xff]  ;;  %v5175_v0 = vpack.c.bf16 %v1538_v63, %v1534_v61  ;;  %v1413_v2 = vld [vmem:[#allocation6 + $0x8] sm:$0xff] }
 0xd0f   :  { %3467 = vmatpush3.msra.mxu0 %v1161_v17  ;;  %v1167_v19 = vmul.f32 %v1166_v59, %v1161_v17  ;;  %v1160_v20 = vmax.f32 %v1158_v18, 0.0  ;;  %v1506_v17 = vld [vmem:[#allocation7 + $0xf0] sm:$0xff]  ;;  %v5143_v11 = vpack.c.bf16 %v1512_v7, %v1508_v5  ;;  %v1417_v5 = vld [vmem:[#allocation6 + $0x28] sm:$0xff]  ;;  %v1415_v7 = vld [vmem:[#allocation6 + $0x18] sm:$0xff] }
 0xd10   :  { %3471 = vmatprep.subr.mxu0 %v5659_v26  ;;  %3759 = vmatpush1.bf16.msra.mxu1 %v5085_v6  ;;  %v5097_v18 = vpack.c.bf16 %v1506_v17, %v1502_v16  ;;  %5758 = vst [vmem:[#allocation26_spill] sm:$0xff] %v5140_v4  ;;  %v1520_v16 = vld [vmem:[#allocation7 + $0x160] sm:$0xff]  ;;  %v1518_v17 = vld [vmem:[#allocation7 + $0x150] sm:$0xff]  ;;  %5769 = vst [vmem:[#allocation37_spill] sm:$0xff] %v5175_v0 }
 0xd11   :  { %1169 = vadd.xlane.f32.xlu1 %v1167_v19  ;;  %v5061_v22 = vadd.f32 %v1160_v20, %v4956_v25  ;;  %3761 = vmatprep.subr.bf16.mxu1 %v5087_v9  ;;  %v1511_v19 = vld [vmem:[#allocation7 + $0x118] sm:$0xff]  ;;  %5759 = vst [vmem:[#allocation27_spill] sm:$0xff] %v5143_v11  ;;  %v1420_v63 = vld [vmem:[#allocation6 + $0x40] sm:$0xff] }
 0xd12   :  { %v1515_v20 = vld [vmem:[#allocation7 + $0x138] sm:$0xff] }
 0xd13   :  { %v1168_v23 = vmul.f32 %v1166_v59, %v5061_v22  ;;  %v5093_v59 = vpack.c.bf16 %v1507_v15, %v1503_v14  ;;  %v5146_v14 = vpack.c.bf16 %v1521_v10, %v1517_v8  ;;  %v1516_v15 = vld [vmem:[#allocation7 + $0x140] sm:$0xff]  ;;  %v5179_v8 = vpack.c.bf16 %v1417_v5, %v1413_v2  ;;  %v1419_v10 = vld [vmem:[#allocation6 + $0x38] sm:$0xff] }
 0xd14   :  { %3763 = vmatpush1.bf16.msra.mxu1 %v5091_v13  ;;  %v1424_v2 = vld [vmem:[#allocation6 + $0x60] sm:$0xff] }
 0xd15   :  { %1171 = vadd.xlane.f32.xlu1 %v1168_v23  ;;  %3765 = vmatprep.subr.bf16.mxu1 %v5093_v59  ;;  %v5099_v23 = vpack.c.bf16 %v1515_v20, %v1511_v19  ;;  %5760 = vst [vmem:[#allocation28_spill] sm:$0xff] %v5146_v14  ;;  %v5150_v19 = vpack.c.bf16 %v1520_v16, %v1516_v15  ;;  %v1522_v20 = vld [vmem:[#allocation7 + $0x170] sm:$0xff]  ;;  %5770 = vst [vmem:[#allocation38_spill] sm:$0xff] %v5179_v8 }
 0xd16   :  { %v5182_v15 = vpack.c.bf16 %v1419_v10, %v1415_v7  ;;  %v1422_v10 = vld [vmem:[#allocation6 + $0x50] sm:$0xff] }
 0xd17   :  { %5761 = vst [vmem:[#allocation29_spill] sm:$0xff] %v5150_v19 }
 0xd18   :  { %3767 = vmatpush1.bf16.msra.mxu1 %v5097_v18  ;;  %5771 = vst [vmem:[#allocation39_spill] sm:$0xff] %v5182_v15 }
 0xd19   :  { %3769 = vmatprep.subr.bf16.mxu1 %v5099_v23 }
 0xd9e   :  { %v1170_v24 = vpop.xlane.xlu1 %1169 }
 0xd9f   :  { %v1178_v31 = vrot.slane %v1170_v24, %v4840_v43 }
 0xda2   :  { %v1172_v27 = vpop.xlane.xlu1 %1171 }
 0xda3   :  { %v1182_v30 = vrot.slane %v1172_v27, %v4840_v43 }
 0xda5   :  { %v1183_v21 = vsel %vm265_vm0, %v1182_v30, %v1178_v31  ;;  %v1519_v30 = vld [vmem:[#allocation7 + $0x158] sm:$0xff] }
 0xda6   :  { %v1185_v32 = vsel %vm268_vm1, %v1183_v21, -inf  ;;  %v1523_v21 = vld [vmem:[#allocation7 + $0x178] sm:$0xff] }
 0xda7   :  { %1186 = vmax.xlane.f32.xlu0 %v1185_v32  ;;  %v5105_v32 = vpack.c.bf16 %v1523_v21, %v1519_v30  ;;  %v1529_v30 = vld [vmem:[#allocation7 + $0x1a8] sm:$0xff]  ;;  %v1527_v21 = vld [vmem:[#allocation7 + $0x198] sm:$0xff] }
 0xe34   :  { %v1187_v36 = vpop.xlane.xlu0 %1186 }
 0xe35   :  { %v1192_v39 = vrot.slane %v1187_v36, %v4816_v29  ;;  %v1196_v25 = vrot.slane %v1187_v36, %v4847_v50  ;;  %v1477_v36 = vld [vmem:[#allocation7 + $0x8] sm:$0xff] }
 0xe37   :  { %v1199_v37 = vsub.f32 %v1170_v24, %v1192_v39  ;;  %v1200_v33 = vsub.f32 %v1172_v27, %v1196_v25  ;;  %v1510_v24 = vld [vmem:[#allocation7 + $0x110] sm:$0xff]  ;;  %v1481_v39 = vld [vmem:[#allocation7 + $0x28] sm:$0xff] }
 0xe38   :  { %v1514_v27 = vld [vmem:[#allocation7 + $0x130] sm:$0xff] }
 0xe39   :  { %v1201_v35 = vmul.f32 1.442695, %v1199_v37  ;;  %v1203_v40 = vmul.f32 1.442695, %v1200_v33  ;;  %v5103_v31 = vpack.c.bf16 %v1514_v27, %v1510_v24  ;;  %v5110_v33 = vpack.c.bf16 %v1481_v39, %v1477_v36  ;;  %v1525_v27 = vld [vmem:[#allocation7 + $0x188] sm:$0xff]  ;;  %v1531_v39 = vld [vmem:[#allocation7 + $0x1b8] sm:$0xff] }
 0xe3a   :  { %v5152_v24 = vpack.c.bf16 %v1522_v20, %v1518_v17  ;;  %v5156_v36 = vpack.c.bf16 %v1529_v30, %v1525_v27  ;;  %v1404_v27 = vrot.slane %v5035_v34, %v5054_v12 }
 0xe3b   :  { %4385 = vpow2.f32 %v1201_v35  ;;  %3771 = vmatpush1.bf16.msra.mxu1 %v5103_v31  ;;  %5750 = vst [vmem:[#allocation18_spill] sm:$0xff] %v5110_v33  ;;  %v1476_v35 = vld [vmem:[#allocation7] sm:$0xff] }
 0xe3c   :  { %4387 = vpow2.f32 %v1203_v40  ;;  %3773 = vmatprep.subr.bf16.mxu1 %v5105_v32  ;;  %v1480_v40 = vld [vmem:[#allocation7 + $0x20] sm:$0xff]  ;;  %5762 = vst [vmem:[#allocation30_spill] sm:$0xff] %v5156_v36 }
 0xe3f   :  { %3775 = vmatpush1.bf16.msra.mxu1 %v5152_v24 }
 0xe45   :  { %v4386_v42 = vpop.eup %4385 }
 0xe46   :  { %v4388_v38 = vpop.eup %4387  ;;  %1208 = vperm.xlu1 %4359, %v4386_v42  }
 0xe47   :  { %1211 = vperm.xlu0 %4360, %v4388_v38  }
 0xec5   :  { %v1209_v44 = vpop.permute.xlu1 %1208 }
 0xec6   :  { %v1212_v45 = vpop.permute.xlu0 %1211  ;;  %v1216_v46 = vrot.slane %v1209_v44, %v4840_v43 }
 0xec7   :  { %v1220_v47 = vrot.slane %v1212_v45, %v4840_v43  ;;  %v5116_v45 = vpack.c.bf16 %v1480_v40, %v1476_v35  ;;  %v5158_v35 = vpack.c.bf16 %v1531_v39, %v1527_v21  ;;  %v1412_v39 = vld [vmem:[#allocation6] sm:$0xff] }
 0xec9   :  { %v1221_v48 = vsel %vm265_vm0, %v1220_v47, %v1216_v46  ;;  %5751 = vst [vmem:[#allocation19_spill] sm:$0xff] %v5116_v45  ;;  %5763 = vst [vmem:[#allocation31_spill] sm:$0xff] %v5158_v35  ;;  %3777 = vmatprep.subr.bf16.mxu1 %v5158_v35  ;;  %v1471_v35 = vld [vmem:[#allocation6 + $0x1d8] sm:$0xff] }
 0xeca   :  { %v1223_v49 = vsel %vm268_vm1, %v1221_v48, 0.0  ;;  %v1484_v48 = vld [vmem:[#allocation7 + $0x40] sm:$0xff] }
 0xecb   :  { %1224 = vadd.xlane.f32.xlu1 %v1223_v49  ;;  %v1488_v49 = vld [vmem:[#allocation7 + $0x60] sm:$0xff] }
 0xf58   :  { %v1225_v51 = vpop.xlane.xlu1 %1224 }
 0xf59   :  { %v1230_v53 = vrot.slane %v1225_v51, %v4816_v29  ;;  %v1234_v55 = vrot.slane %v1225_v51, %v4847_v50  ;;  %v1493_v51 = vld [vmem:[#allocation7 + $0x88] sm:$0xff] }
 0xf5b   :  { %4389 = vrcp.f32 %v1230_v53  ;;  %v1497_v53 = vld [vmem:[#allocation7 + $0xa8] sm:$0xff] }
 0xf5c   :  { %4391 = vrcp.f32 %v1234_v55  ;;  %v5128_v55 = vpack.c.bf16 %v1497_v53, %v1493_v51  ;;  %v1539_v53 = vld [vmem:[#allocation7 + $0x1f8] sm:$0xff] }
 0xf5e   :  { %5754 = vst [vmem:[#allocation22_spill] sm:$0xff] %v5128_v55 }
 0xf65   :  { %v4390_v56 = vpop.eup %4389 }
 0xf66   :  { %v1238_v57 = vmul.f32 %v4390_v56, %v4386_v42  ;;  %v4392_v58 = vpop.eup %4391  ;;  %v1485_v42 = vld [vmem:[#allocation7 + $0x48] sm:$0xff]  ;;  %v1496_v56 = vld [vmem:[#allocation7 + $0xa0] sm:$0xff] }
 0xf67   :  { %v1240_v60 = vmul.f32 %v4392_v58, %v4388_v38  ;;  %v1489_v38 = vld [vmem:[#allocation7 + $0x68] sm:$0xff] }
 0xf68   :  { %1243 = vperm.xlu0 %4360, %v1238_v57   ;;  %v5120_v47 = vpack.c.bf16 %v1489_v38, %v1485_v42  ;;  %v1501_v57 = vld [vmem:[#allocation7 + $0xc8] sm:$0xff]  ;;  %v1526_v42 = vld [vmem:[#allocation7 + $0x190] sm:$0xff] }
 0xf69   :  { %v1505_v58 = vld [vmem:[#allocation7 + $0xe8] sm:$0xff]  ;;  %v1530_v38 = vld [vmem:[#allocation7 + $0x1b0] sm:$0xff] }
 0xf6a   :  { %5752 = vst [vmem:[#allocation20_spill] sm:$0xff] %v5120_v47  ;;  %v5134_v54 = vpack.c.bf16 %v1505_v58, %v1501_v57 }
 0xf6c   :  { %1323 = vperm.xlu0 %4360, %v1240_v60   ;;  %5756 = vst [vmem:[#allocation24_spill] sm:$0xff] %v5134_v54 }
 0xfe7   :  { %v1244_v25 = vpop.permute.xlu0 %1243 }
 0xfe8   :  { %v1248_v37 = vrot.slane %v1244_v25, %v4840_v43  ;;  %v1524_v25 = vld [vmem:[#allocation7 + $0x180] sm:$0xff] }
 0xfea   :  { %3469 = vmatmul.mubr.msk.f32.vlgmr.msra.gmra.mrb[14].mxu0 %vm333_vm3, %v1248_v37  ;;  %v1528_v37 = vld [vmem:[#allocation7 + $0x1a0] sm:$0xff] }
 0xfeb   :  { %3472 = vmatpush3.msra.mxu0 %v5061_v22  ;;  %v1324_v44 = vpop.permute.xlu0 %1323  ;;  %3473 = vmatprep.mubr.msk.f32.mxu0 %vm4632_vm2, %v5659_v26  ;;  %v5124_v22 = vpack.c.bf16 %v1488_v49, %v1484_v48  ;;  %v5160_v40 = vpack.c.bf16 %v1528_v37, %v1524_v25  ;;  %v1537_v48 = vld [vmem:[#allocation7 + $0x1e8] sm:$0xff]  ;;  %v1535_v49 = vld [vmem:[#allocation7 + $0x1d8] sm:$0xff]  ;;  %v1416_v25 = vld [vmem:[#allocation6 + $0x20] sm:$0xff] }
 0xfec   :  { %v1328_v46 = vrot.slane %v1324_v44, %v4840_v43  ;;  %3721 = vmatprep.subr.bf16.mxu0 %v5110_v33  ;;  %v1492_v43 = vld [vmem:[#allocation7 + $0x80] sm:$0xff]  ;;  %v5163_v44 = vpack.c.bf16 %v1530_v38, %v1526_v42  ;;  %v5170_v57 = vpack.c.bf16 %v1539_v53, %v1535_v49  ;;  %v1414_v37 = vld [vmem:[#allocation6 + $0x10] sm:$0xff]  ;;  %v1421_v38 = vld [vmem:[#allocation6 + $0x48] sm:$0xff] }
 0xfed   :  { %5753 = vst [vmem:[#allocation21_spill] sm:$0xff] %v5124_v22  ;;  %v5131_v60 = vpack.c.bf16 %v1496_v56, %v1492_v43  ;;  %5764 = vst [vmem:[#allocation32_spill] sm:$0xff] %v5160_v40  ;;  %v1532_v43 = vld [vmem:[#allocation7 + $0x1c0] sm:$0xff]  ;;  %v1418_v42 = vld [vmem:[#allocation6 + $0x30] sm:$0xff] }
 0xfee   :  { %3474 = vmatmul.mubr.msk.f32.vlgmr.msra.gmra.mrb[16].mxu0 %vm333_vm3, %v1328_v46  ;;  %5765 = vst [vmem:[#allocation33_spill] sm:$0xff] %v5163_v44  ;;  %v1533_v46 = vld [vmem:[#allocation7 + $0x1c8] sm:$0xff]  ;;  %3779 = vmatpush1.bf16.msra.mxu1 %v5163_v44  ;;  %v1536_v56 = vld [vmem:[#allocation7 + $0x1e0] sm:$0xff]  ;;  %5767 = vst [vmem:[#allocation35_spill] sm:$0xff] %v5170_v57  ;;  %v5191_v61 = vpack.c.bf16 %v1418_v42, %v1414_v37 }
 0xfef   :  { %3723 = vmatpush1.bf16.msra.mxu0 %v5116_v45  ;;  %1623 = vmatprep.mubr.f32.mxu0 %v5659_v26  ;;  %5755 = vst [vmem:[#allocation23_spill] sm:$0xff] %v5131_v60  ;;  %v5168_v51 = vpack.c.bf16 %v1537_v48, %v1533_v46  ;;  %v5172_v58 = vpack.c.bf16 %v1536_v56, %v1532_v43  ;;  %v1425_v48 = vld [vmem:[#allocation6 + $0x68] sm:$0xff]  ;;  %v1423_v49 = vld [vmem:[#allocation6 + $0x58] sm:$0xff] }
 0xff0   :  { %3725 = vmatprep.subr.bf16.mxu0 %v5120_v47  ;;  %3781 = vmatprep.subr.bf16.mxu1 %v5170_v57  ;;  %v1427_v53 = vld [vmem:[#allocation6 + $0x78] sm:$0xff]  ;;  %v5189_v56 = vpack.c.bf16 %v1416_v25, %v1412_v39  ;;  %5772 = vst [vmem:[#allocation40_spill] sm:$0xff] %v5191_v61  ;;  %v5194_v5 = vpack.c.bf16 %v1425_v48, %v1421_v38  ;;  %v1432_v25 = vld [vmem:[#allocation6 + $0xa0] sm:$0xff]  ;;  %v1430_v38 = vld [vmem:[#allocation6 + $0x90] sm:$0xff] }
 0xff1   :  { %5766 = vst [vmem:[#allocation34_spill] sm:$0xff] %v5168_v51  ;;  %5768 = vst [vmem:[#allocation36_spill] sm:$0xff] %v5172_v58  ;;  %v5196_v7 = vpack.c.bf16 %v1427_v53, %v1423_v49  ;;  %v1437_v48 = vld [vmem:[#allocation6 + $0xc8] sm:$0xff]  ;;  %v1439_v53 = vld [vmem:[#allocation6 + $0xd8] sm:$0xff] }
 0xff2   :  { %3783 = vmatpush1.bf16.msra.mxu1 %v5175_v0  ;;  %v1441_v49 = vld [vmem:[#allocation6 + $0xe8] sm:$0xff]  ;;  %v1463_v57 = vld [vmem:[#allocation6 + $0x198] sm:$0xff] }
 0xff3   :  { %3727 = vmatpush1.bf16.msra.mxu0 %v5124_v22  ;;  %3817 = vmatprep.subr.bf16.mxu1 %v5182_v15  ;;  %5773 = vst [vmem:[#allocation41_spill] sm:$0xff] %v5196_v7  ;;  %v1455_v15 = vld [vmem:[#allocation6 + $0x158] sm:$0xff]  ;;  %v1465_v0 = vld [vmem:[#allocation6 + $0x1a8] sm:$0xff] }
 0xff4   :  { %3729 = vmatprep.subr.bf16.mxu0 %v5128_v55  ;;  %v1473_v44 = vld [vmem:[#allocation6 + $0x1e8] sm:$0xff] }
 0xff7   :  { %3731 = vmatpush1.bf16.msra.mxu0 %v5131_v60 }
 0xff8   :  { %3733 = vmatprep.subr.bf16.mxu0 %v5134_v54 }
 0xffb   :  { %3735 = vmatpush1.bf16.msra.mxu0 %v5137_v41 }
 0xffc   :  { %3737 = vmatprep.subr.bf16.mxu0 %v5140_v4 }
 0xfff   :  { %3739 = vmatpush1.bf16.msra.mxu0 %v5143_v11 }
0x1000   :  { %3741 = vmatprep.subr.bf16.mxu0 %v5146_v14 }
0x1003   :  { %3743 = vmatpush1.bf16.msra.mxu0 %v5150_v19 }
0x1004   :  { %3745 = vmatprep.subr.bf16.mxu0 %v5156_v36 }
0x1007   :  { %3747 = vmatpush1.bf16.msra.mxu0 %v5160_v40 }
0x1008   :  { %3749 = vmatprep.subr.bf16.mxu0 %v5168_v51 }
0x100b   :  { %3751 = vmatpush1.bf16.msra.mxu0 %v5172_v58 }
0x100c   :  { %3785 = vmatprep.subr.bf16.mxu0 %v5179_v8 }
0x10bd   :  { %v1317_v16 = vpop.f32.mrb[14].mxu0 }
0x10be   :  { %v3470_v17 = vpop.f32.mrb[15].mxu0 }
0x10bf   :  { %v1426_v17 = vld [vmem:[#allocation6 + $0x70] sm:$0xff] }
0x10c0   :  { %v5202_v39 = vpack.c.bf16 %v1426_v17, %v1422_v10  ;;  %v1440_v10 = vld [vmem:[#allocation6 + $0xe0] sm:$0xff]  ;;  %v5220_v17 = vpack.c.bf16 %v1441_v49, %v1437_v48 }
0x10c1   :  { %v1397_v20 = vpop.f32.mrb[16].mxu0 }
0x10c2   :  { %v1407_v30 = vrot.slane %v1397_v20, 7  ;;  %v3475_v21 = vpop.f32.mrb[17].mxu0  ;;  %v1429_v20 = vld [vmem:[#allocation6 + $0x88] sm:$0xff]  ;;  %5774 = vst [vmem:[#allocation42_spill] sm:$0xff] %v5202_v39 }
0x10c3   :  { %v1435_v21 = vld [vmem:[#allocation6 + $0xb8] sm:$0xff] }
0x10c4   :  { %v1408_v46 = vsel %vm265_vm0, %v1407_v30, %v1317_v16  ;;  %v1433_v16 = vld [vmem:[#allocation6 + $0xa8] sm:$0xff]  ;;  %v1431_v30 = vld [vmem:[#allocation6 + $0x98] sm:$0xff] }
0x10c5   :  { %v1410_v43 = vmul.f32 %v1408_v46, %v1404_v27  ;;  %v5200_v27 = vpack.c.bf16 %v1424_v2, %v1420_v63  ;;  %v5206_v37 = vpack.c.bf16 %v1433_v16, %v1429_v20  ;;  %v5208_v42 = vpack.c.bf16 %v1435_v21, %v1431_v30  ;;  %v1434_v46 = vld [vmem:[#allocation6 + $0xb0] sm:$0xff]  ;;  %v1445_v21 = vld [vmem:[#allocation6 + $0x108] sm:$0xff] }
0x10c6   :  { %v5216_v2 = vpack.c.bf16 %v1434_v46, %v1430_v38  ;;  %v1438_v16 = vld [vmem:[#allocation6 + $0xd0] sm:$0xff]  ;;  %v1444_v38 = vld [vmem:[#allocation6 + $0x100] sm:$0xff] }
0x10c7   :  { %v1411_v34 = vadd.f32 %v1410_v43, %v5043_v52  ;;  %v1428_v52 = vld [vmem:[#allocation6 + $0x80] sm:$0xff]  ;;  %5775 = vst [vmem:[#allocation43_spill] sm:$0xff] %v5208_v42  ;;  %v1443_v43 = vld [vmem:[#allocation6 + $0xf8] sm:$0xff]  ;;  %v1442_v30 = vld [vmem:[#allocation6 + $0xf0] sm:$0xff] }
0x10c8   :  { %v5214_v63 = vpack.c.bf16 %v1432_v25, %v1428_v52  ;;  %5776 = vst [vmem:[#allocation44_spill] sm:$0xff] %v5216_v2  ;;  %v5222_v20 = vpack.c.bf16 %v1443_v43, %v1439_v53  ;;  %v5228_v25 = vpack.c.bf16 %v1442_v30, %v1438_v16  ;;  %v1448_v46 = vld [vmem:[#allocation6 + $0x120] sm:$0xff]  ;;  %v1446_v53 = vld [vmem:[#allocation6 + $0x110] sm:$0xff] }
0x10c9   :  { %1624 = vmatmul.mubr.f32.vlgmr.msra.gmra.mrb[18].mxu0 %v1411_v34  ;;  %1695 = vmatmul.mubr.f32.vlgmr.msra.gmra.mrb[4].mxu1 %v1411_v34  ;;  %v1436_v34 = vld [vmem:[#allocation6 + $0xc0] sm:$0xff]  ;;  %v1450_v43 = vld [vmem:[#allocation6 + $0x130] sm:$0xff] }
0x10ca   :  { %3787 = vmatpush1.bf16.msra.mxu0 %v5189_v56  ;;  %3819 = vmatpush1.bf16.msra.mxu1 %v5191_v61  ;;  %5777 = vst [vmem:[#allocation45_spill] sm:$0xff] %v5222_v20  ;;  %v5226_v52 = vpack.c.bf16 %v1440_v10, %v1436_v34  ;;  %5778 = vst [vmem:[#allocation46_spill] sm:$0xff] %v5228_v25  ;;  %v1457_v61 = vld [vmem:[#allocation6 + $0x168] sm:$0xff]  ;;  %v5238_v34 = vpack.c.bf16 %v1448_v46, %v1444_v38  ;;  %v1452_v16 = vld [vmem:[#allocation6 + $0x140] sm:$0xff] }
0x10cb   :  { %3789 = vmatprep.subr.bf16.mxu0 %v5194_v5  ;;  %3821 = vmatprep.subr.bf16.mxu1 %v5196_v7  ;;  %v1447_v7 = vld [vmem:[#allocation6 + $0x118] sm:$0xff]  ;;  %v5240_v10 = vpack.c.bf16 %v1450_v43, %v1446_v53  ;;  %v1456_v30 = vld [vmem:[#allocation6 + $0x160] sm:$0xff] }
0x10cc   :  { %1765 = vmatprep.mubr.f32.mxu0 %v5659_v26  ;;  %1836 = vmatprep.mubr.f32.mxu1 %v5659_v26  ;;  %v1449_v26 = vld [vmem:[#allocation6 + $0x128] sm:$0xff]  ;;  %v5250_v38 = vpack.c.bf16 %v1456_v30, %v1452_v16  ;;  %v1460_v53 = vld [vmem:[#allocation6 + $0x180] sm:$0xff] }
0x10cd   :  { %v5232_v48 = vpack.c.bf16 %v1449_v26, %v1445_v21  ;;  %5780 = vst [vmem:[#allocation48_spill] sm:$0xff] %v5240_v10  ;;  %v1458_v21 = vld [vmem:[#allocation6 + $0x170] sm:$0xff]  ;;  %v1464_v43 = vld [vmem:[#allocation6 + $0x1a0] sm:$0xff] }
0x10ce   :  { %3791 = vmatpush1.bf16.msra.mxu0 %v5200_v27  ;;  %3823 = vmatpush1.bf16.msra.mxu1 %v5202_v39  ;;  %v1451_v39 = vld [vmem:[#allocation6 + $0x138] sm:$0xff]  ;;  %v5262_v16 = vpack.c.bf16 %v1464_v43, %v1460_v53 }
0x10cf   :  { %3793 = vmatprep.subr.bf16.mxu0 %v5206_v37  ;;  %3825 = vmatprep.subr.bf16.mxu1 %v5208_v42  ;;  %v5234_v49 = vpack.c.bf16 %v1451_v39, %v1447_v7  ;;  %v1453_v42 = vld [vmem:[#allocation6 + $0x148] sm:$0xff]  ;;  %v1454_v39 = vld [vmem:[#allocation6 + $0x150] sm:$0xff] }
0x10d0   :  { %v5244_v26 = vpack.c.bf16 %v1457_v61, %v1453_v42  ;;  %v5252_v46 = vpack.c.bf16 %v1458_v21, %v1454_v39  ;;  %v1462_v42 = vld [vmem:[#allocation6 + $0x190] sm:$0xff]  ;;  %v1468_v39 = vld [vmem:[#allocation6 + $0x1c0] sm:$0xff] }
0x10d1   :  { %5779 = vst [vmem:[#allocation47_spill] sm:$0xff] %v5234_v49  ;;  %v1474_v21 = vld [vmem:[#allocation6 + $0x1f0] sm:$0xff] }
0x10d2   :  { %3795 = vmatpush1.bf16.msra.mxu0 %v5214_v63  ;;  %3827 = vmatpush1.bf16.msra.mxu1 %v5216_v2  ;;  %v1459_v2 = vld [vmem:[#allocation6 + $0x178] sm:$0xff]  ;;  %5782 = vst [vmem:[#allocation50_spill] sm:$0xff] %v5252_v46 }
0x10d3   :  { %3797 = vmatprep.subr.bf16.mxu0 %v5220_v17  ;;  %3829 = vmatprep.subr.bf16.mxu1 %v5222_v20  ;;  %v5246_v7 = vpack.c.bf16 %v1459_v2, %v1455_v15  ;;  %v1461_v20 = vld [vmem:[#allocation6 + $0x188] sm:$0xff]  ;;  %v1466_v2 = vld [vmem:[#allocation6 + $0x1b0] sm:$0xff] }
0x10d4   :  { %v5256_v15 = vpack.c.bf16 %v1465_v0, %v1461_v20  ;;  %v5264_v30 = vpack.c.bf16 %v1466_v2, %v1462_v42  ;;  %v1472_v20 = vld [vmem:[#allocation6 + $0x1e0] sm:$0xff]  ;;  %v5707_v2 = vmov 0.0|0.0  }
0x10d5   :  { %5781 = vst [vmem:[#allocation49_spill] sm:$0xff] %v5246_v7  ;;  %v5274_v53 = vpack.c.bf16 %v1472_v20, %v1468_v39  ;;  %v1543_v39 = vld [vmem:[#allocation10 + $0x10] sm:$0xff]  ;;  %v1544_v20 = vld [vmem:[#allocation10 + $0x18] sm:$0xff] }
0x10d6   :  { %3799 = vmatpush1.bf16.msra.mxu0 %v5226_v52  ;;  %3831 = vmatpush1.bf16.msra.mxu1 %v5228_v25  ;;  %v1467_v25 = vld [vmem:[#allocation6 + $0x1b8] sm:$0xff]  ;;  %5784 = vst [vmem:[#allocation52_spill] sm:$0xff] %v5264_v30 }
0x10d7   :  { %3801 = vmatprep.subr.bf16.mxu0 %v5232_v48  ;;  %3833 = vmatprep.subr.bf16.mxu1 %v5234_v49  ;;  %v5258_v61 = vpack.c.bf16 %v1467_v25, %v1463_v57  ;;  %v1469_v49 = vld [vmem:[#allocation6 + $0x1c8] sm:$0xff]  ;;  %v1470_v25 = vld [vmem:[#allocation6 + $0x1d0] sm:$0xff] }
0x10d8   :  { %v5268_v57 = vpack.c.bf16 %v1473_v44, %v1469_v49  ;;  %v5276_v43 = vpack.c.bf16 %v1474_v21, %v1470_v25  ;;  %v5787_v44 = vmov 0.0   ;;  %v1541_v49 = vld [vmem:[#allocation10] sm:$0xff]  ;;  %v5310_v25 = vpack.c.bf16 %v1544_v20, %v1543_v39  ;;  %v1550_v20 = vld [vmem:[#allocation10 + $0x48] sm:$0xff] }
0x10d9   :  { %5783 = vst [vmem:[#allocation51_spill] sm:$0xff] %v5258_v61  ;;  %v1545_v21 = vld [vmem:[#allocation10 + $0x20] sm:$0xff] }
0x10da   :  { %3803 = vmatpush1.bf16.msra.mxu0 %v5238_v34  ;;  %3835 = vmatpush1.bf16.msra.mxu1 %v5240_v10  ;;  %v1475_v10 = vld [vmem:[#allocation6 + $0x1f8] sm:$0xff]  ;;  %5786 = vst [vmem:[#allocation54_spill] sm:$0xff] %v5276_v43  ;;  %v1549_v39 = vld [vmem:[#allocation10 + $0x40] sm:$0xff] }
0x10db   :  { %3805 = vmatprep.subr.bf16.mxu0 %v5244_v26  ;;  %3837 = vmatprep.subr.bf16.mxu1 %v5246_v7  ;;  %v5270_v0 = vpack.c.bf16 %v1475_v10, %v1471_v35  ;;  %v1558_v35 = vld [vmem:[%s5646_s2] sm:$0x3]  ;;  %v1542_v10 = vld [vmem:[#allocation10 + $0x8] sm:$0xff] }
0x10dc   :  { %v5305_v42 = vpack.c.bf16 %v1542_v10, %v1541_v49  ;;  %v1547_v49 = vld [vmem:[#allocation10 + $0x30] sm:$0xff]  ;;  %v1548_v10 = vld [vmem:[#allocation10 + $0x38] sm:$0xff] }
0x10dd   :  { %5785 = vst [vmem:[#allocation53_spill] sm:$0xff] %v5270_v0 }
0x10de   :  { %3807 = vmatpush1.bf16.msra.mxu0 %v5250_v38  ;;  %3839 = vmatpush1.bf16.msra.mxu1 %v5252_v46 }
0x10df   :  { %3809 = vmatprep.subr.bf16.mxu0 %v5256_v15  ;;  %3841 = vmatprep.subr.bf16.mxu1 %v5258_v61 }
0x10e2   :  { %3811 = vmatpush1.bf16.msra.mxu0 %v5262_v16  ;;  %3843 = vmatpush1.bf16.msra.mxu1 %v5264_v30 }
0x10e3   :  { %3813 = vmatprep.subr.bf16.mxu0 %v5268_v57  ;;  %3845 = vmatprep.subr.bf16.mxu1 %v5270_v0 }
0x10e6   :  { %3815 = vmatpush1.bf16.msra.mxu0 %v5274_v53  ;;  %3847 = vmatpush1.bf16.msra.mxu1 %v5276_v43 }
0x10e7   :  { %3873 = vmatprep.subr.bf16.mxu1 %v5110_v33  ;;  %3848 = vmatprep.subr.bf16.mxu0 %v5707_v2 }
0x10e9   :  { %1766 = vmatmul.mubr.f32.vlgmr.msra.gmra.mrb[18].mxu0 %v1558_v35  ;;  %1837 = vmatmul.mubr.f32.vlgmr.msra.gmra.mrb[4].mxu1 %v1558_v35  ;;  %v1546_v35 = vld [vmem:[#allocation10 + $0x28] sm:$0xff] }
0x10ea   :  { %3875 = vmatpush1.bf16.msra.mxu1 %v5116_v45  ;;  %3508 = vmatprep.mubr.msk.f32.mxu0 %vm4632_vm2, %v5787_v44 }
0x10eb   :  { %3877 = vmatprep.subr.bf16.mxu1 %v5120_v47  ;;  %2035 = vmatprep.mubr.f32.mxu1 %v5787_v44 }
0x10ec   :  { %3850 = vmatpush3.bf16.msra.mxu0 %v5305_v42 }
0x10ed   :  { %3851 = vmatprep.subr.bf16.mxu0 %v5707_v2 }
0x10ee   :  { %3879 = vmatpush1.bf16.msra.mxu1 %v5124_v22 }
0x10ef   :  { %3881 = vmatprep.subr.bf16.mxu1 %v5128_v55 }
0x10f0   :  { %3853 = vmatpush3.bf16.msra.mxu0 %v5310_v25 }
0x10f1   :  { %3854 = vmatprep.subr.bf16.mxu0 %v5707_v2 }
0x10f2   :  { %3883 = vmatpush1.bf16.msra.mxu1 %v5131_v60 }
0x10f3   :  { %3885 = vmatprep.subr.bf16.mxu1 %v5134_v54 }
0x10f6   :  { %3887 = vmatpush1.bf16.msra.mxu1 %v5137_v41 }
0x10f7   :  { %3889 = vmatprep.subr.bf16.mxu1 %v5140_v4 }
0x10fa   :  { %3891 = vmatpush1.bf16.msra.mxu1 %v5143_v11  ;;  %v1858_v11 = vsub.s32 3, %v4813_v28 }
0x10fb   :  { %3893 = vmatprep.subr.bf16.mxu1 %v5146_v14  ;;  %v1556_v14 = vld [vmem:[#allocation10 + $0x78] sm:$0xff] }
0x10fe   :  { %3895 = vmatpush1.bf16.msra.mxu1 %v5150_v19  ;;  %v1554_v19 = vld [vmem:[#allocation10 + $0x68] sm:$0xff] }
0x10ff   :  { %3897 = vmatprep.subr.bf16.mxu1 %v5156_v36  ;;  %v1553_v36 = vld [vmem:[#allocation10 + $0x60] sm:$0xff] }
0x1102   :  { %3899 = vmatpush1.bf16.msra.mxu1 %v5160_v40 }
0x1103   :  { %3901 = vmatprep.subr.bf16.mxu1 %v5168_v51  ;;  %v5322_v51 = vpack.c.bf16 %v1550_v20, %v1549_v39  ;;  %v1540_v20 = vld [vmem:[#allocation9] sm:$0xf] }
0x1104   :  { %v5347_v60 = vrot.slane %v1540_v20, %v1858_v11 }
0x1105   :  { %5788 = vst [vmem:[#allocation55_spill] sm:$0xff] %v5322_v51 }
0x1106   :  { %3903 = vmatpush1.bf16.msra.mxu1 %v5172_v58  ;;  %v5318_v58 = vpack.c.bf16 %v1548_v10, %v1547_v49  ;;  %v5329_v49 = vpack.c.bf16 %v1554_v19, %v1553_v36  ;;  %v1555_v10 = vld [vmem:[#allocation10 + $0x70] sm:$0xff]  ;;  %v5342_v19 = vrot.slane %v1540_v20, %v4847_v50  ;;  %5793 = vst [vmem:[#allocation60_spill] sm:$0xff] %v5347_v60 }
0x1107   :  { %3937 = vmatprep.subr.bf16.mxu1 %v5179_v8  ;;  %v5314_v8 = vpack.c.bf16 %v1546_v35, %v1545_v21  ;;  %v1551_v21 = vld [vmem:[#allocation10 + $0x50] sm:$0xff]  ;;  %v1552_v35 = vld [vmem:[#allocation10 + $0x58] sm:$0xff]  ;;  %v5333_v39 = vpack.c.bf16 %v1556_v14, %v1555_v10  ;;  %v5351_v50 = vrot.slane %v1540_v20, %v5054_v12 }
0x1108   :  { %v5326_v40 = vpack.c.bf16 %v1552_v35, %v1551_v21  ;;  %5790 = vst [vmem:[#allocation57_spill] sm:$0xff] %v5329_v49  ;;  %v5339_v21 = vrot.slane %v1540_v20, %v4816_v29 }
0x1109   :  { %3856 = vmatpush3.bf16.msra.mxu0 %v5314_v8  ;;  %5791 = vst [vmem:[#allocation58_spill] sm:$0xff] %v5333_v39 }
0x110a   :  { %3857 = vmatprep.subr.bf16.mxu0 %v5707_v2  ;;  %5789 = vst [vmem:[#allocation56_spill] sm:$0xff] %v5326_v40  ;;  %5792 = vst [vmem:[#allocation59_spill] sm:$0xff] %v5339_v21 }
0x110d   :  { %3859 = vmatpush3.bf16.msra.mxu0 %v5318_v58 }
0x110e   :  { %3860 = vmatprep.subr.bf16.mxu0 %v5707_v2 }
0x1111   :  { %3862 = vmatpush3.bf16.msra.mxu0 %v5322_v51 }
0x1112   :  { %3863 = vmatprep.subr.bf16.mxu0 %v5707_v2 }
0x1115   :  { %3865 = vmatpush3.bf16.msra.mxu0 %v5326_v40 }
0x1116   :  { %3866 = vmatprep.subr.bf16.mxu0 %v5707_v2 }
0x1119   :  { %3868 = vmatpush3.bf16.msra.mxu0 %v5329_v49 }
0x111a   :  { %3869 = vmatprep.subr.bf16.mxu0 %v5707_v2 }
0x111d   :  { %3871 = vmatpush3.bf16.msra.mxu0 %v5333_v39 }
0x111e   :  { %3905 = vmatprep.subr.bf16.mxu0 %v5076_v62 }
0x11bc   :  { %v1767_v36 = vpop.f32.mrb[18].mxu0  ;;  %v1838_v35 = vpop.f32.mrb[4].mxu1 }
0x11bd   :  { %v1864_v14 = vadd.f32 %v5339_v21, %v1767_v36  ;;  %v1769_v10 = vpop.f32.mrb[19].mxu0  ;;  %v1840_v4 = vpop.f32.mrb[5].mxu1  ;;  %v1866_v28 = vadd.f32 %v5351_v50, %v1838_v35 }
0x11be   :  { %v1865_v2 = vadd.f32 %v5342_v19, %v1769_v10  ;;  %v1867_v29 = vadd.f32 %v5347_v60, %v1840_v4 }
0x11bf   :  { %v3166_v41 = vmul.f32 -1.442695, %v1864_v14 }
0x11c0   :  { %v3167_v54 = vmul.f32 -1.442695, %v1865_v2  ;;  %v3168_v55 = vmul.f32 -1.442695, %v1867_v29  ;;  %v5797_v29 = vld [vmem:[#allocation37_spill] sm:$0xff] }
0x11c1   :  { %4393 = vpow2.f32 %v3166_v41 }
0x11c2   :  { %4395 = vpow2.f32 %v3167_v54 }
0x11c3   :  { %4397 = vpow2.f32 %v3168_v55  ;;  %v5794_v55 = vld [vmem:[#allocation31_spill] sm:$0xff] }
0x11c4   :  { %4399 = vtanh.f32 %v1866_v28  ;;  %v3170_v28 = vld [vmem:[%s5646_s2 + $0x2] sm:$0x3] }
0x11cb   :  { %v4394_v22 = vpop.eup %4393 }
0x11cc   :  { %v4396_v36 = vpop.eup %4395  ;;  %v1871_v21 = vadd.f32 1.0, %v4394_v22 }
0x11cd   :  { %v1877_v10 = vadd.f32 1.0, %v4396_v36  ;;  %v4398_v11 = vpop.eup %4397  ;;  %v5798_v36 = vld [vmem:[#allocation39_spill] sm:$0xff] }
0x11ce   :  { %4401 = vrcp.f32 %v1871_v21  ;;  %v4400_v2 = vpop.eup %4399  ;;  %v1884_v4 = vadd.f32 1.0, %v4398_v11  ;;  %v5796_v21 = vld [vmem:[#allocation35_spill] sm:$0xff]  ;;  %v5800_v11 = vld [vmem:[#allocation40_spill] sm:$0xff] }
0x11cf   :  { %4403 = vrcp.f32 %v1877_v10  ;;  %v5799_v10 = vmov 0.0|0.0  }
0x11d0   :  { %4405 = vrcp.f32 %v1884_v4  ;;  %v5805_v4 = vld [vmem:[#allocation45_spill] sm:$0xff] }
0x11d8   :  { %v4402_v41 = vpop.eup %4401 }
0x11d9   :  { %v4404_v54 = vpop.eup %4403  ;;  %v1888_v14 = vmul.f32 %v4402_v41, %v4400_v2  ;;  %v5801_v2 = vld [vmem:[#allocation41_spill] sm:$0xff]  ;;  %v5802_v41 = vld [vmem:[#allocation42_spill] sm:$0xff] }
0x11da   :  { %v1887_v60 = vmul.f32 0.0, %v4404_v54  ;;  %v4406_v20 = vpop.eup %4405  ;;  %v5803_v54 = vld [vmem:[#allocation43_spill] sm:$0xff] }
0x11dc   :  { %v5354_v12 = vadd.f32 %v1888_v14, %v1887_v60  ;;  %v5795_v60 = vld [vmem:[#allocation33_spill] sm:$0xff]  ;;  %v5804_v14 = vld [vmem:[#allocation44_spill] sm:$0xff] }
0x11de   :  { %4407 = vtanh.f32 %v5354_v12 }
0x11e8   :  { %v4408_v35 = vpop.eup %4407 }
0x11e9   :  { %v1891_v22 = vmul.f32 %v4408_v35, %v4406_v20  ;;  %v5806_v20 = vld [vmem:[#allocation46_spill] sm:$0xff]  ;;  %v5807_v35 = vld [vmem:[#allocation47_spill] sm:$0xff] }
0x11eb   :  { %3509 = vmatmul.mubr.f32.vlgmr.msra.gmra.mrb[20].mxu0 %v1891_v22  ;;  %2036 = vmatmul.mubr.f32.vlgmr.msra.gmra.mrb[6].mxu1 %v1891_v22 }
0x11ec   :  { %3907 = vmatpush1.bf16.msra.mxu0 %v5078_v1  ;;  %3939 = vmatpush1.bf16.msra.mxu1 %v5189_v56 }
0x11ed   :  { %3909 = vmatprep.subr.bf16.mxu0 %v5081_v3  ;;  %3941 = vmatprep.subr.bf16.mxu1 %v5194_v5 }
0x11ee   :  { %2106 = vmatprep.mubr.f32.mxu0 %v5787_v44  ;;  %2177 = vmatprep.mubr.f32.mxu1 %v5787_v44 }
0x11f0   :  { %3911 = vmatpush1.bf16.msra.mxu0 %v5085_v6  ;;  %3943 = vmatpush1.bf16.msra.mxu1 %v5200_v27 }
0x11f1   :  { %3913 = vmatprep.subr.bf16.mxu0 %v5087_v9  ;;  %3945 = vmatprep.subr.bf16.mxu1 %v5206_v37 }
0x11f4   :  { %3915 = vmatpush1.bf16.msra.mxu0 %v5091_v13  ;;  %3947 = vmatpush1.bf16.msra.mxu1 %v5214_v63 }
0x11f5   :  { %3917 = vmatprep.subr.bf16.mxu0 %v5093_v59  ;;  %3949 = vmatprep.subr.bf16.mxu1 %v5220_v17 }
0x11f8   :  { %3919 = vmatpush1.bf16.msra.mxu0 %v5097_v18  ;;  %3951 = vmatpush1.bf16.msra.mxu1 %v5226_v52 }
0x11f9   :  { %3921 = vmatprep.subr.bf16.mxu0 %v5099_v23  ;;  %3953 = vmatprep.subr.bf16.mxu1 %v5232_v48 }
0x11fc   :  { %3923 = vmatpush1.bf16.msra.mxu0 %v5103_v31  ;;  %3955 = vmatpush1.bf16.msra.mxu1 %v5238_v34 }
0x11fd   :  { %3925 = vmatprep.subr.bf16.mxu0 %v5105_v32  ;;  %3957 = vmatprep.subr.bf16.mxu1 %v5244_v26 }
0x1200   :  { %3927 = vmatpush1.bf16.msra.mxu0 %v5152_v24  ;;  %3959 = vmatpush1.bf16.msra.mxu1 %v5250_v38 }
0x1201   :  { %3929 = vmatprep.subr.bf16.mxu0 %v5794_v55  ;;  %3961 = vmatprep.subr.bf16.mxu1 %v5256_v15 }
0x1204   :  { %3931 = vmatpush1.bf16.msra.mxu0 %v5795_v60  ;;  %3963 = vmatpush1.bf16.msra.mxu1 %v5262_v16 }
0x1205   :  { %3933 = vmatprep.subr.bf16.mxu0 %v5796_v21  ;;  %3965 = vmatprep.subr.bf16.mxu1 %v5268_v57 }
0x1208   :  { %3935 = vmatpush1.bf16.msra.mxu0 %v5797_v29  ;;  %3967 = vmatpush1.bf16.msra.mxu1 %v5274_v53 }
0x1209   :  { %3969 = vmatprep.subr.bf16.mxu0 %v5798_v36  ;;  %4000 = vmatprep.subr.bf16.mxu1 %v5799_v10 }
0x120b   :  { %2107 = vmatmul.mubr.f32.vlgmr.msra.gmra.mrb[22].mxu0 %v1891_v22  ;;  %2178 = vmatmul.mubr.f32.vlgmr.msra.gmra.mrb[6].mxu1 %v3170_v28  ;;  %v5808_v22 = vld [vmem:[#allocation48_spill] sm:$0xff] }
0x120c   :  { %3971 = vmatpush1.bf16.msra.mxu0 %v5800_v11  ;;  %2248 = vmatprep.mubr.f32.mxu0 %v5787_v44 }
0x120d   :  { %3973 = vmatprep.subr.bf16.mxu0 %v5801_v2  ;;  %4002 = vmatpush3.bf16.msra.mxu1 %v5305_v42 }
0x120e   :  { %4003 = vmatprep.subr.bf16.mxu1 %v5799_v10  ;;  %3543 = vmatprep.mubr.msk.f32.mxu1 %vm4632_vm2, %v5787_v44 }
0x1210   :  { %3975 = vmatpush1.bf16.msra.mxu0 %v5802_v41 }
0x1211   :  { %3977 = vmatprep.subr.bf16.mxu0 %v5803_v54  ;;  %4005 = vmatpush3.bf16.msra.mxu1 %v5310_v25 }
0x1212   :  { %4006 = vmatprep.subr.bf16.mxu1 %v5799_v10 }
0x1214   :  { %3979 = vmatpush1.bf16.msra.mxu0 %v5804_v14 }
0x1215   :  { %3981 = vmatprep.subr.bf16.mxu0 %v5805_v4  ;;  %4008 = vmatpush3.bf16.msra.mxu1 %v5314_v8 }
0x1216   :  { %4009 = vmatprep.subr.bf16.mxu1 %v5799_v10 }
0x1218   :  { %3983 = vmatpush1.bf16.msra.mxu0 %v5806_v20 }
0x1219   :  { %3985 = vmatprep.subr.bf16.mxu0 %v5807_v35  ;;  %4011 = vmatpush3.bf16.msra.mxu1 %v5318_v58 }
0x121a   :  { %4012 = vmatprep.subr.bf16.mxu1 %v5799_v10 }
0x121c   :  { %3987 = vmatpush1.bf16.msra.mxu0 %v5808_v22 }
0x121d   :  { %3989 = vmatprep.subr.bf16.mxu0 %v5246_v7  ;;  %4014 = vmatpush3.bf16.msra.mxu1 %v5322_v51 }
0x121e   :  { %4015 = vmatprep.subr.bf16.mxu1 %v5799_v10 }
0x1220   :  { %3991 = vmatpush1.bf16.msra.mxu0 %v5252_v46 }
0x1221   :  { %3993 = vmatprep.subr.bf16.mxu0 %v5258_v61  ;;  %4017 = vmatpush3.bf16.msra.mxu1 %v5326_v40  ;;  %v5818_v40 = vld [vmem:[#allocation30_spill] sm:$0xff] }
0x1222   :  { %4018 = vmatprep.subr.bf16.mxu1 %v5799_v10 }
0x1224   :  { %3995 = vmatpush1.bf16.msra.mxu0 %v5264_v30  ;;  %v5811_v30 = vld [vmem:[#allocation23_spill] sm:$0xff] }
0x1225   :  { %3997 = vmatprep.subr.bf16.mxu0 %v5270_v0  ;;  %4020 = vmatpush3.bf16.msra.mxu1 %v5329_v49  ;;  %v5809_v0 = vld [vmem:[#allocation21_spill] sm:$0xff]  ;;  %v5810_v49 = vld [vmem:[#allocation22_spill] sm:$0xff] }
0x1226   :  { %4021 = vmatprep.subr.bf16.mxu1 %v5799_v10 }
0x1228   :  { %3999 = vmatpush1.bf16.msra.mxu0 %v5276_v43  ;;  %v5812_v43 = vld [vmem:[#allocation24_spill] sm:$0xff] }
0x1229   :  { %4025 = vmatprep.subr.bf16.mxu0 %v5110_v33  ;;  %4023 = vmatpush3.bf16.msra.mxu1 %v5333_v39  ;;  %v5813_v33 = vld [vmem:[#allocation25_spill] sm:$0xff]  ;;  %v5814_v39 = vld [vmem:[#allocation26_spill] sm:$0xff] }
0x122a   :  { %4057 = vmatprep.subr.bf16.mxu1 %v5076_v62  ;;  %v5815_v62 = vld [vmem:[#allocation27_spill] sm:$0xff] }
0x122b   :  { %2249 = vmatmul.mubr.f32.vlgmr.msra.gmra.mrb[22].mxu0 %v3170_v28  ;;  %v5816_v28 = vld [vmem:[#allocation28_spill] sm:$0xff] }
0x122c   :  { %4027 = vmatpush1.bf16.msra.mxu0 %v5116_v45  ;;  %2421 = vmatprep.mubr.f32.mxu0 %v5787_v44  ;;  %v5817_v45 = vld [vmem:[#allocation29_spill] sm:$0xff] }
0x122d   :  { %4029 = vmatprep.subr.bf16.mxu0 %v5120_v47  ;;  %v5819_v47 = vld [vmem:[#allocation32_spill] sm:$0xff] }
0x1230   :  { %4031 = vmatpush1.bf16.msra.mxu0 %v5809_v0  ;;  %v5820_v0 = vld [vmem:[#allocation34_spill] sm:$0xff] }
0x1231   :  { %4033 = vmatprep.subr.bf16.mxu0 %v5810_v49  ;;  %v5821_v49 = vld [vmem:[#allocation36_spill] sm:$0xff] }
0x1234   :  { %4035 = vmatpush1.bf16.msra.mxu0 %v5811_v30  ;;  %v5822_v30 = vld [vmem:[#allocation38_spill] sm:$0xff] }
0x1235   :  { %4037 = vmatprep.subr.bf16.mxu0 %v5812_v43  ;;  %v5446_v43 = vld [vmem:[#allocation12] ss:$0 sm:$0xff] }
0x1236   :  { %5823 = vst [vmem:[#allocation31_spill] sm:$0xff] %v5446_v43 }
0x1238   :  { %4039 = vmatpush1.bf16.msra.mxu0 %v5813_v33 }
0x1239   :  { %4041 = vmatprep.subr.bf16.mxu0 %v5814_v39 }
0x123c   :  { %4043 = vmatpush1.bf16.msra.mxu0 %v5815_v62 }
0x123d   :  { %4045 = vmatprep.subr.bf16.mxu0 %v5816_v28  ;;  %v5824_v28 = vld [vmem:[#allocation59_spill] sm:$0xff] }
0x1240   :  { %4047 = vmatpush1.bf16.msra.mxu0 %v5817_v45 }
0x1241   :  { %4049 = vmatprep.subr.bf16.mxu0 %v5818_v40 }
0x1244   :  { %4051 = vmatpush1.bf16.msra.mxu0 %v5819_v47 }
0x1245   :  { %4053 = vmatprep.subr.bf16.mxu0 %v5820_v0 }
0x1248   :  { %4055 = vmatpush1.bf16.msra.mxu0 %v5821_v49 }
0x1249   :  { %4089 = vmatprep.subr.bf16.mxu0 %v5822_v30 }
0x12be   :  { %v1964_v33 = vpop.f32.mrb[20].mxu0 }
0x12bf   :  { %v1965_v39 = vadd.f32 %v5446_v43, %v1964_v33  ;;  %v3510_v62 = vpop.f32.mrb[21].mxu0 }
0x12c1   :  { %1968 = vst [vmem:[%s5658_s14] sm:$0x3] %v1965_v39  ;;  %v5825_v39 = vld [vmem:[#allocation60_spill] sm:$0xff] }
0x12de   :  { %v2179_v45 = vpop.f32.mrb[6].mxu1 }
0x12df   :  { %v2181_v40 = vpop.f32.mrb[7].mxu1  ;;  %v2255_v0 = vadd.f32 %v2179_v45, %v5824_v28 }
0x12e0   :  { %v2256_v47 = vadd.f32 %v2181_v40, %v5342_v19 }
0x12e1   :  { %v3171_v49 = vmul.f32 -1.442695, %v2255_v0 }
0x12e2   :  { %v3172_v61 = vmul.f32 -1.442695, %v2256_v47 }
0x12e4   :  { %4409 = vpow2.f32 %v3172_v61 }
0x12e5   :  { %4411 = vpow2.f32 %v3171_v49 }
0x12ee   :  { %v4410_v30 = vpop.eup %4409 }
0x12ef   :  { %v4412_v46 = vpop.eup %4411  ;;  %v2268_v51 = vadd.f32 1.0, %v4410_v30 }
0x12f0   :  { %v2262_v7 = vadd.f32 1.0, %v4412_v46 }
0x12f1   :  { %4413 = vrcp.f32 %v2268_v51 }
0x12f2   :  { %4415 = vrcp.f32 %v2262_v7 }
0x12fb   :  { %v4414_v45 = vpop.eup %4413 }
0x12fc   :  { %v4416_v47 = vpop.eup %4415  ;;  %v2278_v61 = vmul.f32 %v4414_v45, %v5354_v12  ;;  %v5826_v12 = vld [vmem:[#allocation48_spill] sm:$0xff] }
0x12fd   :  { %v5831_v45 = vld [vmem:[#allocation56_spill] sm:$0xff] }
0x12fe   :  { %v2250_v33 = vpop.f32.mrb[22].mxu0 }
0x12ff   :  { %v2257_v62 = vadd.f32 %v2250_v33, %v5351_v50  ;;  %v2252_v43 = vpop.f32.mrb[23].mxu0 }
0x1300   :  { %v2258_v22 = vadd.f32 %v2252_v43, %v5825_v39  ;;  %v3175_v43 = vld [vmem:[%s5646_s2 + $0x4] sm:$0x3] }
0x1301   :  { %4417 = vtanh.f32 %v2257_v62  ;;  %v5829_v62 = vld [vmem:[#allocation50_spill] sm:$0xff] }
0x1302   :  { %v3173_v40 = vmul.f32 -1.442695, %v2258_v22  ;;  %v5827_v22 = vld [vmem:[#allocation49_spill] sm:$0xff] }
0x1304   :  { %4419 = vpow2.f32 %v3173_v40  ;;  %v5830_v40 = vld [vmem:[#allocation51_spill] sm:$0xff] }
0x130b   :  { %v4418_v0 = vpop.eup %4417 }
0x130c   :  { %v2279_v49 = vmul.f32 %v4418_v0, %v4416_v47  ;;  %v5832_v47 = vld [vmem:[#allocation52_spill] sm:$0xff]  ;;  %v5833_v0 = vld [vmem:[#allocation53_spill] sm:$0xff] }
0x130e   :  { %v4420_v28 = vpop.eup %4419  ;;  %v5457_v30 = vadd.f32 %v2279_v49, %v2278_v61  ;;  %v5834_v61 = vld [vmem:[#allocation57_spill] sm:$0xff]  ;;  %v5835_v49 = vld [vmem:[#allocation54_spill] sm:$0xff] }
0x130f   :  { %v2275_v46 = vadd.f32 1.0, %v4420_v28  ;;  %v5828_v28 = vld [vmem:[#allocation55_spill] sm:$0xff] }
0x1310   :  { %4421 = vtanh.f32 %v5457_v30 }
0x1311   :  { %4423 = vrcp.f32 %v2275_v46  ;;  %v5836_v46 = vld [vmem:[#allocation18_spill] sm:$0xff] }
0x131a   :  { %v4422_v51 = vpop.eup %4421 }
0x131b   :  { %v4424_v7 = vpop.eup %4423 }
0x131c   :  { %v2282_v33 = vmul.f32 %v4424_v7, %v4422_v51  ;;  %v5837_v51 = vld [vmem:[#allocation58_spill] sm:$0xff]  ;;  %v5838_v7 = vld [vmem:[#allocation17_spill] sm:$0xff] }
0x131e   :  { %3544 = vmatmul.mubr.f32.vlgmr.msra.gmra.mrb[8].mxu1 %v2282_v33  ;;  %2422 = vmatmul.mubr.f32.vlgmr.msra.gmra.mrb[24].mxu0 %v2282_v33 }
0x131f   :  { %4059 = vmatpush1.bf16.msra.mxu1 %v5078_v1  ;;  %4091 = vmatpush1.bf16.msra.mxu0 %v5189_v56 }
0x1320   :  { %4061 = vmatprep.subr.bf16.mxu1 %v5081_v3  ;;  %4093 = vmatprep.subr.bf16.mxu0 %v5194_v5 }
0x1321   :  { %2492 = vmatprep.mubr.f32.mxu1 %v5787_v44  ;;  %2563 = vmatprep.mubr.f32.mxu0 %v5787_v44 }
0x1323   :  { %4063 = vmatpush1.bf16.msra.mxu1 %v5085_v6  ;;  %4095 = vmatpush1.bf16.msra.mxu0 %v5200_v27 }
0x1324   :  { %4065 = vmatprep.subr.bf16.mxu1 %v5087_v9  ;;  %4097 = vmatprep.subr.bf16.mxu0 %v5206_v37 }
0x1327   :  { %4067 = vmatpush1.bf16.msra.mxu1 %v5091_v13  ;;  %4099 = vmatpush1.bf16.msra.mxu0 %v5214_v63 }
0x1328   :  { %4069 = vmatprep.subr.bf16.mxu1 %v5093_v59  ;;  %4101 = vmatprep.subr.bf16.mxu0 %v5220_v17 }
0x132b   :  { %4071 = vmatpush1.bf16.msra.mxu1 %v5097_v18  ;;  %4103 = vmatpush1.bf16.msra.mxu0 %v5226_v52 }
0x132c   :  { %4073 = vmatprep.subr.bf16.mxu1 %v5099_v23  ;;  %4105 = vmatprep.subr.bf16.mxu0 %v5232_v48 }
0x132f   :  { %4075 = vmatpush1.bf16.msra.mxu1 %v5103_v31  ;;  %4107 = vmatpush1.bf16.msra.mxu0 %v5238_v34 }
0x1330   :  { %4077 = vmatprep.subr.bf16.mxu1 %v5105_v32  ;;  %4109 = vmatprep.subr.bf16.mxu0 %v5244_v26 }
0x1333   :  { %4079 = vmatpush1.bf16.msra.mxu1 %v5152_v24  ;;  %4111 = vmatpush1.bf16.msra.mxu0 %v5250_v38 }
0x1334   :  { %4081 = vmatprep.subr.bf16.mxu1 %v5794_v55  ;;  %4113 = vmatprep.subr.bf16.mxu0 %v5256_v15 }
0x1337   :  { %4083 = vmatpush1.bf16.msra.mxu1 %v5795_v60  ;;  %4115 = vmatpush1.bf16.msra.mxu0 %v5262_v16 }
0x1338   :  { %4085 = vmatprep.subr.bf16.mxu1 %v5796_v21  ;;  %4117 = vmatprep.subr.bf16.mxu0 %v5268_v57 }
0x133b   :  { %4087 = vmatpush1.bf16.msra.mxu1 %v5797_v29  ;;  %4119 = vmatpush1.bf16.msra.mxu0 %v5274_v53 }
0x133c   :  { %4121 = vmatprep.subr.bf16.mxu1 %v5798_v36  ;;  %4152 = vmatprep.subr.bf16.mxu0 %v5799_v10 }
0x133e   :  { %2493 = vmatmul.mubr.f32.vlgmr.msra.gmra.mrb[10].mxu1 %v2282_v33  ;;  %2564 = vmatmul.mubr.f32.vlgmr.msra.gmra.mrb[24].mxu0 %v3175_v43  ;;  %v5839_v33 = vld [vmem:[#allocation19_spill] sm:$0xff] }
0x133f   :  { %4123 = vmatpush1.bf16.msra.mxu1 %v5800_v11  ;;  %2634 = vmatprep.mubr.f32.mxu1 %v5787_v44 }
0x1340   :  { %4125 = vmatprep.subr.bf16.mxu1 %v5801_v2  ;;  %4154 = vmatpush3.bf16.msra.mxu0 %v5305_v42 }
0x1341   :  { %4155 = vmatprep.subr.bf16.mxu0 %v5799_v10  ;;  %3578 = vmatprep.mubr.msk.f32.mxu0 %vm4632_vm2, %v5787_v44 }
0x1343   :  { %4127 = vmatpush1.bf16.msra.mxu1 %v5802_v41 }
0x1344   :  { %4129 = vmatprep.subr.bf16.mxu1 %v5803_v54  ;;  %4157 = vmatpush3.bf16.msra.mxu0 %v5310_v25 }
0x1345   :  { %4158 = vmatprep.subr.bf16.mxu0 %v5799_v10 }
0x1347   :  { %4131 = vmatpush1.bf16.msra.mxu1 %v5804_v14 }
0x1348   :  { %4133 = vmatprep.subr.bf16.mxu1 %v5805_v4  ;;  %4160 = vmatpush3.bf16.msra.mxu0 %v5314_v8 }
0x1349   :  { %4161 = vmatprep.subr.bf16.mxu0 %v5799_v10 }
0x134b   :  { %4135 = vmatpush1.bf16.msra.mxu1 %v5806_v20 }
0x134c   :  { %4137 = vmatprep.subr.bf16.mxu1 %v5807_v35  ;;  %4163 = vmatpush3.bf16.msra.mxu0 %v5318_v58 }
0x134d   :  { %4164 = vmatprep.subr.bf16.mxu0 %v5799_v10 }
0x134f   :  { %4139 = vmatpush1.bf16.msra.mxu1 %v5826_v12 }
0x1350   :  { %4141 = vmatprep.subr.bf16.mxu1 %v5827_v22  ;;  %4166 = vmatpush3.bf16.msra.mxu0 %v5828_v28 }
0x1351   :  { %4167 = vmatprep.subr.bf16.mxu0 %v5799_v10 }
0x1353   :  { %4143 = vmatpush1.bf16.msra.mxu1 %v5829_v62 }
0x1354   :  { %4145 = vmatprep.subr.bf16.mxu1 %v5830_v40  ;;  %4169 = vmatpush3.bf16.msra.mxu0 %v5831_v45  ;;  %v5843_v45 = vld [vmem:[#allocation23_spill] sm:$0xff]  ;;  %v5850_v40 = vld [vmem:[#allocation30_spill] sm:$0xff] }
0x1355   :  { %4170 = vmatprep.subr.bf16.mxu0 %v5799_v10 }
0x1357   :  { %4147 = vmatpush1.bf16.msra.mxu1 %v5832_v47  ;;  %v5840_v47 = vld [vmem:[#allocation20_spill] sm:$0xff] }
0x1358   :  { %4149 = vmatprep.subr.bf16.mxu1 %v5833_v0  ;;  %4172 = vmatpush3.bf16.msra.mxu0 %v5834_v61  ;;  %v5841_v0 = vld [vmem:[#allocation21_spill] sm:$0xff]  ;;  %v5842_v61 = vld [vmem:[#allocation22_spill] sm:$0xff] }
0x1359   :  { %4173 = vmatprep.subr.bf16.mxu0 %v5799_v10 }
0x135b   :  { %4151 = vmatpush1.bf16.msra.mxu1 %v5835_v49  ;;  %v5844_v49 = vld [vmem:[#allocation24_spill] sm:$0xff] }
0x135c   :  { %4177 = vmatprep.subr.bf16.mxu1 %v5836_v46  ;;  %4175 = vmatpush3.bf16.msra.mxu0 %v5837_v51  ;;  %v5845_v46 = vld [vmem:[#allocation25_spill] sm:$0xff]  ;;  %v5846_v51 = vld [vmem:[#allocation26_spill] sm:$0xff] }
0x135d   :  { %4209 = vmatprep.subr.bf16.mxu0 %v5838_v7  ;;  %v5847_v7 = vld [vmem:[#allocation27_spill] sm:$0xff] }
0x135e   :  { %2635 = vmatmul.mubr.f32.vlgmr.msra.gmra.mrb[10].mxu1 %v3175_v43  ;;  %v5848_v43 = vld [vmem:[#allocation28_spill] sm:$0xff] }
0x135f   :  { %4179 = vmatpush1.bf16.msra.mxu1 %v5839_v33  ;;  %2807 = vmatprep.mubr.f32.mxu1 %v5787_v44  ;;  %v5849_v33 = vld [vmem:[#allocation29_spill] sm:$0xff] }
0x1360   :  { %4181 = vmatprep.subr.bf16.mxu1 %v5840_v47  ;;  %v5851_v47 = vld [vmem:[#allocation32_spill] sm:$0xff] }
0x1363   :  { %4183 = vmatpush1.bf16.msra.mxu1 %v5841_v0  ;;  %v5852_v0 = vld [vmem:[#allocation34_spill] sm:$0xff] }
0x1364   :  { %4185 = vmatprep.subr.bf16.mxu1 %v5842_v61  ;;  %v5853_v61 = vld [vmem:[#allocation36_spill] sm:$0xff] }
0x1367   :  { %4187 = vmatpush1.bf16.msra.mxu1 %v5843_v45  ;;  %v5854_v45 = vld [vmem:[#allocation38_spill] sm:$0xff] }
0x1368   :  { %4189 = vmatprep.subr.bf16.mxu1 %v5844_v49 }
0x136b   :  { %4191 = vmatpush1.bf16.msra.mxu1 %v5845_v46  ;;  %v5855_v46 = vld [vmem:[#allocation31_spill] sm:$0xff] }
0x136c   :  { %4193 = vmatprep.subr.bf16.mxu1 %v5846_v51 }
0x136f   :  { %4195 = vmatpush1.bf16.msra.mxu1 %v5847_v7 }
0x1370   :  { %4197 = vmatprep.subr.bf16.mxu1 %v5848_v43 }
0x1373   :  { %4199 = vmatpush1.bf16.msra.mxu1 %v5849_v33  ;;  %v5856_v33 = vld [vmem:[#allocation59_spill] sm:$0xff] }
0x1374   :  { %4201 = vmatprep.subr.bf16.mxu1 %v5850_v40 }
0x1377   :  { %4203 = vmatpush1.bf16.msra.mxu1 %v5851_v47 }
0x1378   :  { %4205 = vmatprep.subr.bf16.mxu1 %v5852_v0 }
0x137b   :  { %4207 = vmatpush1.bf16.msra.mxu1 %v5853_v61 }
0x137c   :  { %4241 = vmatprep.subr.bf16.mxu1 %v5854_v45 }
0x13f1   :  { %v2349_v49 = vpop.f32.mrb[8].mxu1 }
0x13f2   :  { %v2350_v62 = vadd.f32 %v5855_v46, %v2349_v49  ;;  %v3545_v51 = vpop.f32.mrb[9].mxu1 }
0x13f4   :  { %3174 = vst [vmem:[%s5658_s14 + $0x2] sm:$0x3] %v2350_v62 }
0x1411   :  { %v2565_v7 = vpop.f32.mrb[24].mxu0 }
0x1412   :  { %v2567_v43 = vpop.f32.mrb[25].mxu0  ;;  %v2641_v47 = vadd.f32 %v2565_v7, %v5856_v33 }
0x1413   :  { %v2642_v40 = vadd.f32 %v2567_v43, %v5342_v19 }
0x1414   :  { %v3176_v0 = vmul.f32 -1.442695, %v2641_v47 }
0x1415   :  { %v3177_v28 = vmul.f32 -1.442695, %v2642_v40 }
0x1417   :  { %4425 = vpow2.f32 %v3177_v28 }
0x1418   :  { %4427 = vpow2.f32 %v3176_v0 }
0x1421   :  { %v4426_v61 = vpop.eup %4425 }
0x1422   :  { %v4428_v45 = vpop.eup %4427  ;;  %v2654_v22 = vadd.f32 1.0, %v4426_v61 }
0x1423   :  { %v2648_v12 = vadd.f32 1.0, %v4428_v45 }
0x1424   :  { %4429 = vrcp.f32 %v2654_v22 }
0x1425   :  { %4431 = vrcp.f32 %v2648_v12 }
0x142e   :  { %v4430_v7 = vpop.eup %4429 }
0x142f   :  { %v4432_v40 = vpop.eup %4431  ;;  %v2664_v28 = vmul.f32 %v4430_v7, %v5457_v30 }
0x1431   :  { %v2636_v49 = vpop.f32.mrb[10].mxu1 }
0x1432   :  { %v2643_v51 = vadd.f32 %v2636_v49, %v5351_v50  ;;  %v2638_v46 = vpop.f32.mrb[11].mxu1 }
0x1433   :  { %v2644_v62 = vadd.f32 %v2638_v46, %v5825_v39 }
0x1434   :  { %4433 = vtanh.f32 %v2643_v51 }
0x1435   :  { %v3178_v43 = vmul.f32 -1.442695, %v2644_v62 }
0x1437   :  { %4435 = vpow2.f32 %v3178_v43 }
0x143e   :  { %v4434_v47 = vpop.eup %4433 }
0x143f   :  { %v2665_v0 = vmul.f32 %v4434_v47, %v4432_v40 }
0x1441   :  { %v4436_v33 = vpop.eup %4435  ;;  %v5558_v61 = vadd.f32 %v2665_v0, %v2664_v28 }
0x1442   :  { %v2661_v45 = vadd.f32 1.0, %v4436_v33 }
0x1443   :  { %4437 = vtanh.f32 %v5558_v61 }
0x1444   :  { %4439 = vrcp.f32 %v2661_v45 }
0x144d   :  { %v4438_v22 = vpop.eup %4437 }
0x144e   :  { %v4440_v12 = vpop.eup %4439 }
0x144f   :  { %v2668_v49 = vmul.f32 %v4440_v12, %v4438_v22 }
0x1451   :  { %3579 = vmatmul.mubr.f32.vlgmr.msra.gmra.mrb[26].mxu0 %v2668_v49  ;;  %2808 = vmatmul.mubr.f32.vlgmr.msra.gmra.mrb[12].mxu1 %v2668_v49 }
0x1452   :  { %4211 = vmatpush1.bf16.msra.mxu0 %v5078_v1  ;;  %4243 = vmatpush1.bf16.msra.mxu1 %v5189_v56  ;;  %v3180_v1 = vld [vmem:[%s5646_s2 + $0x6] sm:$0x3]  ;;  %v5868_v56 = vld [vmem:[#allocation31_spill] sm:$0xff] }
0x1453   :  { %4213 = vmatprep.subr.bf16.mxu0 %v5081_v3  ;;  %4245 = vmatprep.subr.bf16.mxu1 %v5194_v5  ;;  %v5857_v3 = vld [vmem:[#allocation48_spill] sm:$0xff] }
0x1454   :  { %2878 = vmatprep.mubr.f32.mxu0 %v5787_v44  ;;  %2949 = vmatprep.mubr.f32.mxu1 %v5787_v44 }
0x1456   :  { %4215 = vmatpush1.bf16.msra.mxu0 %v5085_v6  ;;  %4247 = vmatpush1.bf16.msra.mxu1 %v5200_v27  ;;  %v5858_v6 = vld [vmem:[#allocation49_spill] sm:$0xff] }
0x1457   :  { %4217 = vmatprep.subr.bf16.mxu0 %v5087_v9  ;;  %4249 = vmatprep.subr.bf16.mxu1 %v5206_v37  ;;  %v5859_v9 = vld [vmem:[#allocation55_spill] sm:$0xff] }
0x145a   :  { %4219 = vmatpush1.bf16.msra.mxu0 %v5091_v13  ;;  %4251 = vmatpush1.bf16.msra.mxu1 %v5214_v63  ;;  %v5860_v13 = vld [vmem:[#allocation50_spill] sm:$0xff] }
0x145b   :  { %4221 = vmatprep.subr.bf16.mxu0 %v5093_v59  ;;  %4253 = vmatprep.subr.bf16.mxu1 %v5220_v17  ;;  %v5861_v59 = vld [vmem:[#allocation51_spill] sm:$0xff] }
0x145e   :  { %4223 = vmatpush1.bf16.msra.mxu0 %v5097_v18  ;;  %4255 = vmatpush1.bf16.msra.mxu1 %v5226_v52  ;;  %v5862_v18 = vld [vmem:[#allocation56_spill] sm:$0xff]  ;;  %v5869_v52 = vld [vmem:[#allocation59_spill] sm:$0xff] }
0x145f   :  { %4225 = vmatprep.subr.bf16.mxu0 %v5099_v23  ;;  %4257 = vmatprep.subr.bf16.mxu1 %v5232_v48  ;;  %v5863_v23 = vld [vmem:[#allocation52_spill] sm:$0xff] }
0x1462   :  { %4227 = vmatpush1.bf16.msra.mxu0 %v5103_v31  ;;  %4259 = vmatpush1.bf16.msra.mxu1 %v5238_v34  ;;  %v5864_v31 = vld [vmem:[#allocation53_spill] sm:$0xff] }
0x1463   :  { %4229 = vmatprep.subr.bf16.mxu0 %v5105_v32  ;;  %4261 = vmatprep.subr.bf16.mxu1 %v5244_v26  ;;  %v5865_v32 = vld [vmem:[#allocation57_spill] sm:$0xff] }
0x1466   :  { %4231 = vmatpush1.bf16.msra.mxu0 %v5152_v24  ;;  %4263 = vmatpush1.bf16.msra.mxu1 %v5250_v38  ;;  %v5866_v24 = vld [vmem:[#allocation54_spill] sm:$0xff] }
0x1467   :  { %4233 = vmatprep.subr.bf16.mxu0 %v5794_v55  ;;  %4265 = vmatprep.subr.bf16.mxu1 %v5256_v15 }
0x146a   :  { %4235 = vmatpush1.bf16.msra.mxu0 %v5795_v60  ;;  %4267 = vmatpush1.bf16.msra.mxu1 %v5262_v16 }
0x146b   :  { %4237 = vmatprep.subr.bf16.mxu0 %v5796_v21  ;;  %4269 = vmatprep.subr.bf16.mxu1 %v5268_v57 }
0x146e   :  { %4239 = vmatpush1.bf16.msra.mxu0 %v5797_v29  ;;  %4271 = vmatpush1.bf16.msra.mxu1 %v5274_v53 }
0x146f   :  { %4273 = vmatprep.subr.bf16.mxu0 %v5798_v36  ;;  %4304 = vmatprep.subr.bf16.mxu1 %v5799_v10 }
0x1471   :  { %2879 = vmatmul.mubr.f32.vlgmr.msra.gmra.mrb[28].mxu0 %v2668_v49  ;;  %2950 = vmatmul.mubr.f32.vlgmr.msra.gmra.mrb[12].mxu1 %v3180_v1 }
0x1472   :  { %4275 = vmatpush1.bf16.msra.mxu0 %v5800_v11  ;;  %3020 = vmatprep.mubr.f32.mxu0 %v5787_v44 }
0x1473   :  { %4277 = vmatprep.subr.bf16.mxu0 %v5801_v2  ;;  %4306 = vmatpush3.bf16.msra.mxu1 %v5305_v42 }
0x1474   :  { %4307 = vmatprep.subr.bf16.mxu1 %v5799_v10  ;;  %3613 = vmatprep.mubr.msk.f32.mxu1 %vm4632_vm2, %v5787_v44 }
0x1476   :  { %4279 = vmatpush1.bf16.msra.mxu0 %v5802_v41 }
0x1477   :  { %4281 = vmatprep.subr.bf16.mxu0 %v5803_v54  ;;  %4309 = vmatpush3.bf16.msra.mxu1 %v5310_v25 }
0x1478   :  { %4310 = vmatprep.subr.bf16.mxu1 %v5799_v10 }
0x147a   :  { %4283 = vmatpush1.bf16.msra.mxu0 %v5804_v14 }
0x147b   :  { %4285 = vmatprep.subr.bf16.mxu0 %v5805_v4  ;;  %4312 = vmatpush3.bf16.msra.mxu1 %v5314_v8 }
0x147c   :  { %4313 = vmatprep.subr.bf16.mxu1 %v5799_v10 }
0x147e   :  { %4287 = vmatpush1.bf16.msra.mxu0 %v5806_v20 }
0x147f   :  { %4289 = vmatprep.subr.bf16.mxu0 %v5807_v35  ;;  %4315 = vmatpush3.bf16.msra.mxu1 %v5318_v58  ;;  %v5867_v58 = vld [vmem:[#allocation58_spill] sm:$0xff] }
0x1480   :  { %4316 = vmatprep.subr.bf16.mxu1 %v5799_v10 }
0x1482   :  { %4291 = vmatpush1.bf16.msra.mxu0 %v5857_v3 }
0x1483   :  { %4293 = vmatprep.subr.bf16.mxu0 %v5858_v6  ;;  %4318 = vmatpush3.bf16.msra.mxu1 %v5859_v9 }
0x1484   :  { %4319 = vmatprep.subr.bf16.mxu1 %v5799_v10 }
0x1486   :  { %4295 = vmatpush1.bf16.msra.mxu0 %v5860_v13 }
0x1487   :  { %4297 = vmatprep.subr.bf16.mxu0 %v5861_v59  ;;  %4321 = vmatpush3.bf16.msra.mxu1 %v5862_v18 }
0x1488   :  { %4322 = vmatprep.subr.bf16.mxu1 %v5799_v10 }
0x148a   :  { %4299 = vmatpush1.bf16.msra.mxu0 %v5863_v23 }
0x148b   :  { %4301 = vmatprep.subr.bf16.mxu0 %v5864_v31  ;;  %4324 = vmatpush3.bf16.msra.mxu1 %v5865_v32 }
0x148c   :  { %4325 = vmatprep.subr.bf16.mxu1 %v5799_v10 }
0x148e   :  { %4303 = vmatpush1.bf16.msra.mxu0 %v5866_v24 }
0x148f   :  { %4327 = vmatpush3.bf16.msra.mxu1 %v5867_v58 }
0x1491   :  { %3021 = vmatmul.mubr.f32.vlgmr.msra.gmra.mrb[28].mxu0 %v3180_v1 }
0x1524   :  { %v2735_v8 = vpop.f32.mrb[26].mxu0 }
0x1525   :  { %v2736_v5 = vadd.f32 %v5868_v56, %v2735_v8  ;;  %v3580_v27 = vpop.f32.mrb[27].mxu0 }
0x1527   :  { %3179 = vst [vmem:[%s5658_s14 + $0x4] sm:$0x3] %v2736_v5 }
0x1544   :  { %v2951_v37 = vpop.f32.mrb[12].mxu1 }
0x1545   :  { %v2953_v63 = vpop.f32.mrb[13].mxu1  ;;  %v3027_v48 = vadd.f32 %v2951_v37, %v5869_v52 }
0x1546   :  { %v3028_v17 = vadd.f32 %v2953_v63, %v5342_v19 }
0x1547   :  { %v3181_v26 = vmul.f32 -1.442695, %v3027_v48 }
0x1548   :  { %v3182_v34 = vmul.f32 -1.442695, %v3028_v17 }
0x154a   :  { %4441 = vpow2.f32 %v3182_v34 }
0x154b   :  { %4443 = vpow2.f32 %v3181_v26 }
0x1554   :  { %v4442_v38 = vpop.eup %4441 }
0x1555   :  { %v4444_v15 = vpop.eup %4443  ;;  %v3040_v16 = vadd.f32 1.0, %v4442_v38 }
0x1556   :  { %v3034_v57 = vadd.f32 1.0, %v4444_v15 }
0x1557   :  { %4445 = vrcp.f32 %v3040_v16 }
0x1558   :  { %4447 = vrcp.f32 %v3034_v57 }
0x1561   :  { %v4446_v55 = vpop.eup %4445 }
0x1562   :  { %v4448_v60 = vpop.eup %4447  ;;  %v3050_v29 = vmul.f32 %v4446_v55, %v5558_v61 }
0x1564   :  { %v3022_v53 = vpop.f32.mrb[28].mxu0 }
0x1565   :  { %v3029_v44 = vadd.f32 %v3022_v53, %v5351_v50  ;;  %v3024_v42 = vpop.f32.mrb[29].mxu0 }
0x1566   :  { %v3030_v25 = vadd.f32 %v3024_v42, %v5825_v39 }
0x1567   :  { %4449 = vtanh.f32 %v3029_v44 }
0x1568   :  { %v3183_v19 = vmul.f32 -1.442695, %v3030_v25 }
0x156a   :  { %4451 = vpow2.f32 %v3183_v19 }
0x1571   :  { %v4450_v21 = vpop.eup %4449 }
0x1572   :  { %v3051_v36 = vmul.f32 %v4450_v21, %v4448_v60 }
0x1574   :  { %v4452_v10 = vpop.eup %4451  ;;  %v3052_v11 = vadd.f32 %v3051_v36, %v3050_v29 }
0x1575   :  { %v3047_v2 = vadd.f32 1.0, %v4452_v10 }
0x1576   :  { %4453 = vtanh.f32 %v3052_v11 }
0x1577   :  { %4455 = vrcp.f32 %v3047_v2 }
0x1580   :  { %v4454_v41 = vpop.eup %4453 }
0x1581   :  { %v4456_v50 = vpop.eup %4455 }
0x1582   :  { %v3054_v54 = vmul.f32 %v4456_v50, %v4454_v41 }
0x1584   :  { %3614 = vmatmul.mubr.f32.vlgmr.msra.gmra.mrb[14].mxu1 %v3054_v54 }
0x1657   :  { %v3121_v14 = vpop.f32.mrb[14].mxu1 }
0x1658   :  { %v3122_v4 = vadd.f32 %v5868_v56, %v3121_v14  ;;  %v3615_v20 = vpop.f32.mrb[15].mxu1 }
0x165a   :  { %3184 = vst [vmem:[%s5658_s14 + $0x6] sm:$0x3] %v3122_v4 }
0x165b   :  { %3131 = vsyncpa [#allocation3], 1 }
0x165c   :  { %3132 = vsyncpa [#allocation5], 1 }
0x165d   :  { %3133 = vsyncpa [#allocation8], 1 }
0x165e   :  { %3134 = vsyncpa [#allocation11], 1 }

</bundles_post_ra>
